<compile_context>
chip_gen: v7x
topology: tpu7x:2x2x1
jax: 0.10.0
libtpu: 0.0.40
codegen_flags: <defaults>
</compile_context>

<pallas_src>
import jax
import jax.numpy as jnp
from jax.experimental import pallas as pl
from jax.experimental.pallas import tpu as pltpu

# config.EMBEDDING_DIM is not provided in the snippet; pick a small value.
EMBEDDING_DIM = 32
TRUE_SIZES = [EMBEDDING_DIM, 200, 100, 50, 10, 1]
# Padded (in, out) widths per layer. Layer-1 K stays at the true 32 (no pad);
# all N pads are the 128-lane minimum.
IN_PADS = [EMBEDDING_DIM, 256, 128, 128, 128]
OUT_PADS = [256, 128, 128, 128, 128]
NEG_SLOPE = 0.01          # PyTorch nn.LeakyReLU default
BATCH_TILE = 2048         # max rows per grid step (large-batch regime)


def _round_up(n, m):
    return (n + m - 1) // m * m


def _leaky_relu(x):
    return jnp.where(x > 0, x, NEG_SLOPE * x)


def _sigmoid_stable(x):
    # Never exponentiates a positive number: sigmoid(x) = 1/(1+e^-x) for x>=0,
    # e^x/(1+e^x) for x<0. Exact division (tiny: only the 1 real output lane).
    z = jnp.exp(-jnp.abs(x))
    return jnp.where(x >= 0, 1.0, z) / (1.0 + z)


def mlp_kernel(x_ref,
               w1_ref, b1_ref,
               w2_ref, b2_ref,
               w3_ref, b3_ref,
               w4_ref, b4_ref,
               w5_ref, b5_ref,
               o_ref):
    # bf16 MXU operands, f32 accumulation; biases + activations in f32, cast
    # back to bf16 only as the next matmul operand.
    h = x_ref[...]                                                    # (TB, 32) bf16

    h = jnp.dot(h, w1_ref[...], preferred_element_type=jnp.float32) + b1_ref[...]
    h = _leaky_relu(h).astype(jnp.bfloat16)

    h = jnp.dot(h, w2_ref[...], preferred_element_type=jnp.float32) + b2_ref[...]
    h = _leaky_relu(h).astype(jnp.bfloat16)

    h = jnp.dot(h, w3_ref[...], preferred_element_type=jnp.float32) + b3_ref[...]
    h = _leaky_relu(h).astype(jnp.bfloat16)

    h = jnp.dot(h, w4_ref[...], preferred_element_type=jnp.float32) + b4_ref[...]
    h = _leaky_relu(h).astype(jnp.bfloat16)

    h = jnp.dot(h, w5_ref[...], preferred_element_type=jnp.float32) + b5_ref[...]

    # True result is column 0 of the padded last layer; store only that.
    logit = h[:, :1]                                                  # (TB, 1) f32
    o_ref[...] = _sigmoid_stable(logit).astype(o_ref.dtype)


@jax.jit
def neural_network_forward(x, padded_params):
    """x: (batch, EMBEDDING_DIM) f32/bf16; padded_params: list of (Wp, bp).

    Wp: (IN_PADS[i], OUT_PADS[i]) bf16, zero-padded; bp: (1, OUT_PADS[i]) f32.
    Returns (batch, 1) f32.
    """
    batch, emb = x.shape

    # Adaptive tile: never larger than the (128-aligned) real batch, capped at
    # BATCH_TILE for the large-batch regime (keeps VMEM bounded on v7x and
    # gives grid length >= 2 / megacore once batch > BATCH_TILE).
    batch_tile = min(BATCH_TILE, _round_up(max(batch, 1), 128))
    padded_batch = _round_up(max(batch, 1), batch_tile)

    xp = x.astype(jnp.bfloat16)
    if padded_batch != batch:
        # Row-pad only; feature dim stays at the true width (32).
        xp = jnp.zeros((padded_batch, emb), jnp.bfloat16).at[:batch].set(xp)

    flat_params = [a for wb in padded_params for a in wb]
    grid = (padded_batch // batch_tile,)

    in_specs = [pl.BlockSpec((batch_tile, emb), lambda i: (i, 0))]
    for arr in flat_params:
        # Constant block index -> DMA'd once, VMEM-resident across the grid.
        in_specs.append(pl.BlockSpec(arr.shape, lambda i: (0, 0)))

    out_shape = jax.ShapeDtypeStruct((padded_batch, 1), jnp.float32)
    out_spec = pl.BlockSpec((batch_tile, 1), lambda i: (i, 0))

    out_padded = pl.pallas_call(
        mlp_kernel,
        grid=grid,
        in_specs=in_specs,
        out_specs=out_spec,
        out_shape=out_shape,
        compiler_params=pltpu.CompilerParams(
            dimension_semantics=("parallel",)),   # 2 TCs on v7x; harmless elsewhere
    )(xp, *flat_params)

    # Drop padded rows (cheap (batch,1) slice; padded rows hold sigmoid(bias
    # chain) garbage and must not be returned).
    return out_padded[:batch]


def init_params(key):
    """PyTorch nn.Linear-style init: U(-k, k), k = 1/sqrt(fan_in). Unpadded f32."""
    params = []
    for i in range(len(TRUE_SIZES) - 1):
        fan_in, fan_out = TRUE_SIZES[i], TRUE_SIZES[i + 1]
        key, kw, kb = jax.random.split(key, 3)
        bound = 1.0 / (fan_in ** 0.5)
        w = jax.random.uniform(kw, (fan_in, fan_out), jnp.float32,
                               minval=-bound, maxval=bound)
        b = jax.random.uniform(kb, (1, fan_out), jnp.float32,
                               minval=-bound, maxval=bound)
        params.append((w, b))
    return params


def pad_params(params):
    """Zero-pad weights/biases to the (IN_PADS, OUT_PADS) widths.

    Weights -> bf16 (MXU operand), biases -> f32 (added to f32 accumulator).
    Zero padding is exact: padded K lanes contribute 0 to the accumulation and
    padded N lanes never reach the stored column-0 output.
    """
    padded = []
    for i, (w, b) in enumerate(params):
        kin, kout = IN_PADS[i], OUT_PADS[i]
        wp = jnp.zeros((kin, kout), jnp.bfloat16)
        wp = wp.at[:w.shape[0], :w.shape[1]].set(w.astype(jnp.bfloat16))
        bp = jnp.zeros((1, kout), jnp.float32)
        bp = bp.at[:, :b.shape[1]].set(b.astype(jnp.float32))
        padded.append((wp, bp))
    return padded


def reference_forward(x, params):
    """Pure-JAX reference with the same bf16-operand / f32-accumulate scheme."""
    h = x.astype(jnp.bfloat16)
    for i, (w, b) in enumerate(params):
        h = jnp.dot(h, w.astype(jnp.bfloat16),
                    preferred_element_type=jnp.float32) + b
        if i < len(params) - 1:
            h = jnp.where(h > 0, h, NEG_SLOPE * h).astype(jnp.bfloat16)
    return jax.nn.sigmoid(h)


if __name__ == "__main__":
    key = jax.random.PRNGKey(0)
    key, kx = jax.random.split(key)
    batch = 8
    x = jax.random.normal(kx, (batch, EMBEDDING_DIM), jnp.float32)

    params = init_params(key)
    padded_params = pad_params(params)

    out = neural_network_forward(x, padded_params)
    out = jax.block_until_ready(out)

    ref = reference_forward(x, params)
    assert out.shape == (batch, 1), out.shape
    # Exact (non-approx) sigmoid now; remaining error is bf16 operand rounding,
    # shared with the reference -> tight-ish tolerance.
    assert jnp.allclose(out, ref, atol=1e-2, rtol=1e-2), (
        f"mismatch vs reference: max abs err {jnp.max(jnp.abs(out - ref))}")

    print("KERNEL_OK")
</pallas_src>

<mosaic_0001>
module attributes {stable_mosaic.version = 11 : i64} {
  func.func @mlp_kernel(%arg0: i32, %arg1: memref<128x32xbf16, #tpu.memory_space<vmem>>, %arg2: memref<32x256xbf16, #tpu.memory_space<vmem>>, %arg3: memref<1x256xf32, #tpu.memory_space<vmem>>, %arg4: memref<256x128xbf16, #tpu.memory_space<vmem>>, %arg5: memref<1x128xf32, #tpu.memory_space<vmem>>, %arg6: memref<128x128xbf16, #tpu.memory_space<vmem>>, %arg7: memref<1x128xf32, #tpu.memory_space<vmem>>, %arg8: memref<128x128xbf16, #tpu.memory_space<vmem>>, %arg9: memref<1x128xf32, #tpu.memory_space<vmem>>, %arg10: memref<128x128xbf16, #tpu.memory_space<vmem>>, %arg11: memref<1x128xf32, #tpu.memory_space<vmem>>, %arg12: memref<128x1xf32, #tpu.memory_space<vmem>>) attributes {dimension_semantics = [#tpu.dimension_semantics<parallel>], iteration_bounds = array<i64: 1>, scalar_prefetch = 0 : i64, scratch_operands = 0 : i64, tpu.core_type = #tpu.core_type<tc>, window_params = [{transform_indices = @transform_0, window_bounds = array<i64: 128, 32>}, {pipeline_mode = #tpu.pipeline_mode<synchronous>, transform_indices = @transform_1, window_bounds = array<i64: 32, 256>}, {pipeline_mode = #tpu.pipeline_mode<synchronous>, transform_indices = @transform_2, window_bounds = array<i64: 1, 256>}, {pipeline_mode = #tpu.pipeline_mode<synchronous>, transform_indices = @transform_3, window_bounds = array<i64: 256, 128>}, {pipeline_mode = #tpu.pipeline_mode<synchronous>, transform_indices = @transform_4, window_bounds = array<i64: 1, 128>}, {pipeline_mode = #tpu.pipeline_mode<synchronous>, transform_indices = @transform_5, window_bounds = array<i64: 128, 128>}, {pipeline_mode = #tpu.pipeline_mode<synchronous>, transform_indices = @transform_6, window_bounds = array<i64: 1, 128>}, {pipeline_mode = #tpu.pipeline_mode<synchronous>, transform_indices = @transform_7, window_bounds = array<i64: 128, 128>}, {pipeline_mode = #tpu.pipeline_mode<synchronous>, transform_indices = @transform_8, window_bounds = array<i64: 1, 128>}, {pipeline_mode = #tpu.pipeline_mode<synchronous>, transform_indices = @transform_9, window_bounds = array<i64: 128, 128>}, {pipeline_mode = #tpu.pipeline_mode<synchronous>, transform_indices = @transform_10, window_bounds = array<i64: 1, 128>}, {transform_indices = @transform_11, window_bounds = array<i64: 128, 1>}]} {
    %c0 = arith.constant 0 : index
    %c0_0 = arith.constant 0 : index
    %0 = vector.load %arg1[%c0, %c0_0] : memref<128x32xbf16, #tpu.memory_space<vmem>>, vector<128x32xbf16>
    %c0_1 = arith.constant 0 : index
    %c0_2 = arith.constant 0 : index
    %1 = vector.load %arg2[%c0_1, %c0_2] : memref<32x256xbf16, #tpu.memory_space<vmem>>, vector<32x256xbf16>
    %cst = arith.constant dense<0.000000e+00> : vector<128x256xf32>
    %2 = tpu.matmul %0, %1, %cst {dimension_numbers = #tpu.dot_dimension_numbers<[1], [0], [0], [1], [0, 0, 1, 1], [], []>} : vector<128x32xbf16>, vector<32x256xbf16>, vector<128x256xf32> -> vector<128x256xf32>
    %c0_3 = arith.constant 0 : index
    %c0_4 = arith.constant 0 : index
    %3 = vector.load %arg3[%c0_3, %c0_4] : memref<1x256xf32, #tpu.memory_space<vmem>>, vector<1x256xf32>
    %4 = vector.broadcast %3 : vector<1x256xf32> to vector<128x256xf32>
    %5 = arith.addf %2, %4 : vector<128x256xf32>
    %cst_5 = arith.constant 0.000000e+00 : f32
    %6 = vector.broadcast %cst_5 : f32 to vector<128x256xf32>
    %7 = arith.cmpf ogt, %5, %6 : vector<128x256xf32>
    %cst_6 = arith.constant 0.00999999977 : f32
    %8 = vector.broadcast %cst_6 : f32 to vector<128x256xf32>
    %9 = arith.mulf %8, %5 : vector<128x256xf32>
    %10 = arith.select %7, %5, %9 : vector<128x256xi1>, vector<128x256xf32>
    %11 = arith.truncf %10 : vector<128x256xf32> to vector<128x256xbf16>
    %c0_7 = arith.constant 0 : index
    %c0_8 = arith.constant 0 : index
    %12 = vector.load %arg4[%c0_7, %c0_8] : memref<256x128xbf16, #tpu.memory_space<vmem>>, vector<256x128xbf16>
    %cst_9 = arith.constant dense<0.000000e+00> : vector<128x128xf32>
    %13 = tpu.matmul %11, %12, %cst_9 {dimension_numbers = #tpu.dot_dimension_numbers<[1], [0], [0], [1], [0, 0, 1, 1], [], []>} : vector<128x256xbf16>, vector<256x128xbf16>, vector<128x128xf32> -> vector<128x128xf32>
    %c0_10 = arith.constant 0 : index
    %c0_11 = arith.constant 0 : index
    %14 = vector.load %arg5[%c0_10, %c0_11] : memref<1x128xf32, #tpu.memory_space<vmem>>, vector<1x128xf32>
    %15 = vector.broadcast %14 : vector<1x128xf32> to vector<128x128xf32>
    %16 = arith.addf %13, %15 : vector<128x128xf32>
    %cst_12 = arith.constant 0.000000e+00 : f32
    %17 = vector.broadcast %cst_12 : f32 to vector<128x128xf32>
    %18 = arith.cmpf ogt, %16, %17 : vector<128x128xf32>
    %cst_13 = arith.constant 0.00999999977 : f32
    %19 = vector.broadcast %cst_13 : f32 to vector<128x128xf32>
    %20 = arith.mulf %19, %16 : vector<128x128xf32>
    %21 = arith.select %18, %16, %20 : vector<128x128xi1>, vector<128x128xf32>
    %22 = arith.truncf %21 : vector<128x128xf32> to vector<128x128xbf16>
    %c0_14 = arith.constant 0 : index
    %c0_15 = arith.constant 0 : index
    %23 = vector.load %arg6[%c0_14, %c0_15] : memref<128x128xbf16, #tpu.memory_space<vmem>>, vector<128x128xbf16>
    %cst_16 = arith.constant dense<0.000000e+00> : vector<128x128xf32>
    %24 = tpu.matmul %22, %23, %cst_16 {dimension_numbers = #tpu.dot_dimension_numbers<[1], [0], [0], [1], [0, 0, 1, 1], [], []>} : vector<128x128xbf16>, vector<128x128xbf16>, vector<128x128xf32> -> vector<128x128xf32>
    %c0_17 = arith.constant 0 : index
    %c0_18 = arith.constant 0 : index
    %25 = vector.load %arg7[%c0_17, %c0_18] : memref<1x128xf32, #tpu.memory_space<vmem>>, vector<1x128xf32>
    %26 = vector.broadcast %25 : vector<1x128xf32> to vector<128x128xf32>
    %27 = arith.addf %24, %26 : vector<128x128xf32>
    %cst_19 = arith.constant 0.000000e+00 : f32
    %28 = vector.broadcast %cst_19 : f32 to vector<128x128xf32>
    %29 = arith.cmpf ogt, %27, %28 : vector<128x128xf32>
    %cst_20 = arith.constant 0.00999999977 : f32
    %30 = vector.broadcast %cst_20 : f32 to vector<128x128xf32>
    %31 = arith.mulf %30, %27 : vector<128x128xf32>
    %32 = arith.select %29, %27, %31 : vector<128x128xi1>, vector<128x128xf32>
    %33 = arith.truncf %32 : vector<128x128xf32> to vector<128x128xbf16>
    %c0_21 = arith.constant 0 : index
    %c0_22 = arith.constant 0 : index
    %34 = vector.load %arg8[%c0_21, %c0_22] : memref<128x128xbf16, #tpu.memory_space<vmem>>, vector<128x128xbf16>
    %cst_23 = arith.constant dense<0.000000e+00> : vector<128x128xf32>
    %35 = tpu.matmul %33, %34, %cst_23 {dimension_numbers = #tpu.dot_dimension_numbers<[1], [0], [0], [1], [0, 0, 1, 1], [], []>} : vector<128x128xbf16>, vector<128x128xbf16>, vector<128x128xf32> -> vector<128x128xf32>
    %c0_24 = arith.constant 0 : index
    %c0_25 = arith.constant 0 : index
    %36 = vector.load %arg9[%c0_24, %c0_25] : memref<1x128xf32, #tpu.memory_space<vmem>>, vector<1x128xf32>
    %37 = vector.broadcast %36 : vector<1x128xf32> to vector<128x128xf32>
    %38 = arith.addf %35, %37 : vector<128x128xf32>
    %cst_26 = arith.constant 0.000000e+00 : f32
    %39 = vector.broadcast %cst_26 : f32 to vector<128x128xf32>
    %40 = arith.cmpf ogt, %38, %39 : vector<128x128xf32>
    %cst_27 = arith.constant 0.00999999977 : f32
    %41 = vector.broadcast %cst_27 : f32 to vector<128x128xf32>
    %42 = arith.mulf %41, %38 : vector<128x128xf32>
    %43 = arith.select %40, %38, %42 : vector<128x128xi1>, vector<128x128xf32>
    %44 = arith.truncf %43 : vector<128x128xf32> to vector<128x128xbf16>
    %c0_28 = arith.constant 0 : index
    %c0_29 = arith.constant 0 : index
    %45 = vector.load %arg10[%c0_28, %c0_29] : memref<128x128xbf16, #tpu.memory_space<vmem>>, vector<128x128xbf16>
    %cst_30 = arith.constant dense<0.000000e+00> : vector<128x128xf32>
    %46 = tpu.matmul %44, %45, %cst_30 {dimension_numbers = #tpu.dot_dimension_numbers<[1], [0], [0], [1], [0, 0, 1, 1], [], []>} : vector<128x128xbf16>, vector<128x128xbf16>, vector<128x128xf32> -> vector<128x128xf32>
    %c0_31 = arith.constant 0 : index
    %c0_32 = arith.constant 0 : index
    %47 = vector.load %arg11[%c0_31, %c0_32] : memref<1x128xf32, #tpu.memory_space<vmem>>, vector<1x128xf32>
    %48 = vector.broadcast %47 : vector<1x128xf32> to vector<128x128xf32>
    %49 = arith.addf %46, %48 : vector<128x128xf32>
    %50 = vector.extract_strided_slice %49 {offsets = [0, 0], sizes = [128, 1], strides = [1, 1]} : vector<128x128xf32> to vector<128x1xf32>
    %51 = math.absf %50 : vector<128x1xf32>
    %cst_33 = arith.constant 0.000000e+00 : f32
    %52 = vector.broadcast %cst_33 : f32 to vector<128x1xf32>
    %53 = arith.subf %52, %51 : vector<128x1xf32>
    %54 = math.exp %53 : vector<128x1xf32>
    %cst_34 = arith.constant 0.000000e+00 : f32
    %55 = vector.broadcast %cst_34 : f32 to vector<128x1xf32>
    %56 = arith.cmpf oge, %50, %55 : vector<128x1xf32>
    %cst_35 = arith.constant 1.000000e+00 : f32
    %57 = vector.broadcast %cst_35 : f32 to vector<128x1xf32>
    %58 = arith.select %56, %57, %54 : vector<128x1xi1>, vector<128x1xf32>
    %cst_36 = arith.constant 1.000000e+00 : f32
    %59 = vector.broadcast %cst_36 : f32 to vector<128x1xf32>
    %60 = arith.addf %59, %54 : vector<128x1xf32>
    %61 = arith.divf %58, %60 : vector<128x1xf32>
    %c0_37 = arith.constant 0 : index
    %c0_38 = arith.constant 0 : index
    %62 = vector.load %arg12[%c0_37, %c0_38] : memref<128x1xf32, #tpu.memory_space<vmem>>, vector<128x1xf32>
    tpu.vector_store %arg12[%c0_37, %c0_38], %61 {strides = array<i32>} : memref<128x1xf32, #tpu.memory_space<vmem>>, vector<128x1xf32>,
    return
  }
  func.func @transform_0(%arg0: i32) -> (i32, i32) {
    %c0_i32 = arith.constant 0 : i32
    %c0_i32_0 = arith.constant 0 : i32
    return %arg0, %c0_i32 : i32, i32
  }
  func.func @transform_1(%arg0: i32) -> (i32, i32) {
    %c0_i32 = arith.constant 0 : i32
    %c0_i32_0 = arith.constant 0 : i32
    %c0_i32_1 = arith.constant 0 : i32
    return %c0_i32, %c0_i32_0 : i32, i32
  }
  func.func @transform_2(%arg0: i32) -> (i32, i32) {
    %c0_i32 = arith.constant 0 : i32
    %c0_i32_0 = arith.constant 0 : i32
    %c0_i32_1 = arith.constant 0 : i32
    return %c0_i32, %c0_i32_0 : i32, i32
  }
  func.func @transform_3(%arg0: i32) -> (i32, i32) {
    %c0_i32 = arith.constant 0 : i32
    %c0_i32_0 = arith.constant 0 : i32
    %c0_i32_1 = arith.constant 0 : i32
    return %c0_i32, %c0_i32_0 : i32, i32
  }
  func.func @transform_4(%arg0: i32) -> (i32, i32) {
    %c0_i32 = arith.constant 0 : i32
    %c0_i32_0 = arith.constant 0 : i32
    %c0_i32_1 = arith.constant 0 : i32
    return %c0_i32, %c0_i32_0 : i32, i32
  }
  func.func @transform_5(%arg0: i32) -> (i32, i32) {
    %c0_i32 = arith.constant 0 : i32
    %c0_i32_0 = arith.constant 0 : i32
    %c0_i32_1 = arith.constant 0 : i32
    return %c0_i32, %c0_i32_0 : i32, i32
  }
  func.func @transform_6(%arg0: i32) -> (i32, i32) {
    %c0_i32 = arith.constant 0 : i32
    %c0_i32_0 = arith.constant 0 : i32
    %c0_i32_1 = arith.constant 0 : i32
    return %c0_i32, %c0_i32_0 : i32, i32
  }
  func.func @transform_7(%arg0: i32) -> (i32, i32) {
    %c0_i32 = arith.constant 0 : i32
    %c0_i32_0 = arith.constant 0 : i32
    %c0_i32_1 = arith.constant 0 : i32
    return %c0_i32, %c0_i32_0 : i32, i32
  }
  func.func @transform_8(%arg0: i32) -> (i32, i32) {
    %c0_i32 = arith.constant 0 : i32
    %c0_i32_0 = arith.constant 0 : i32
    %c0_i32_1 = arith.constant 0 : i32
    return %c0_i32, %c0_i32_0 : i32, i32
  }
  func.func @transform_9(%arg0: i32) -> (i32, i32) {
    %c0_i32 = arith.constant 0 : i32
    %c0_i32_0 = arith.constant 0 : i32
    %c0_i32_1 = arith.constant 0 : i32
    return %c0_i32, %c0_i32_0 : i32, i32
  }
  func.func @transform_10(%arg0: i32) -> (i32, i32) {
    %c0_i32 = arith.constant 0 : i32
    %c0_i32_0 = arith.constant 0 : i32
    %c0_i32_1 = arith.constant 0 : i32
    return %c0_i32, %c0_i32_0 : i32, i32
  }
  func.func @transform_11(%arg0: i32) -> (i32, i32) {
    %c0_i32 = arith.constant 0 : i32
    %c0_i32_0 = arith.constant 0 : i32
    return %arg0, %c0_i32 : i32, i32
  }
}

</mosaic_0001>

<bundles_post_ra>
// kernel: neural_network_forward.1
= control target key start
LH: loop header
LB: loop body
LE: loop exit
PB: predicated region body
PF: predicated region fallthrough
CT: control target
= control target key end

     0   :  { %16 = vsyncpa [#allocation3], 0  ;;  %s2392_s0 = inlined_call_operand.vmem [shape: bf16[128,32], index: 0, kind: input, shape index: {}]   ;;  %s2393_s1 = inlined_call_operand.vmem [shape: bf16[32,256], index: 1, kind: input, shape index: {}]   ;;  %s2394_s2 = inlined_call_operand.vmem [shape: f32[1,256], index: 2, kind: input, shape index: {}]   ;;  %s2395_s3 = inlined_call_operand.hbm [shape: bf16[256,128], index: 3, kind: input, shape index: {}]   ;;  %s2396_s4 = inlined_call_operand.vmem [shape: f32[1,128], index: 4, kind: input, shape index: {}]   ;;  %s2397_s5 = inlined_call_operand.vmem [shape: bf16[128,128], index: 5, kind: input, shape index: {}]   ;;  %s2398_s6 = inlined_call_operand.vmem [shape: f32[1,128], index: 6, kind: input, shape index: {}]   ;;  %s2399_s7 = inlined_call_operand.hbm [shape: bf16[128,128], index: 7, kind: input, shape index: {}]   ;;  %s2400_s8 = inlined_call_operand.vmem [shape: f32[1,128], index: 8, kind: input, shape index: {}]   ;;  %s2401_s9 = inlined_call_operand.hbm [shape: bf16[128,128], index: 9, kind: input, shape index: {}]   ;;  %s2402_s10 = inlined_call_operand.vmem [shape: f32[1,128], index: 10, kind: input, shape index: {}]   ;;  %s2403_s11 = inlined_call_operand.vmem [shape: f32[128,1], index: 11, kind: output, shape index: {}]  }
   0x1   :  { %17 = vsyncpa [#allocation5], 0  ;;  %s1959_s17 = smov [#allocation4]   ;;  %s1960_s19 = smov [#allocation2]  }
   0x2   :  { %s47_s18 = sshll.u32 %s1959_s17, 4  ;;  %s29_s20 = sshll.u32 %s1960_s19, 4  ;;  %s48_s18 = int_to_ptr.vmem [resolvable:$true] %s47_s18  ;;  %s2025_s20 = int_to_ptr.vmem [resolvable:$true] %s29_s20 }
   0x3   :  { %s1889_s23 = scalar_lea.hbm %s2399_s7, 1024 }
   0x4   :  { %p1890_p0 = scmp.ne.s32.totalorder %s2399_s7, %s1889_s23  ;;  %p1893_p1 = scmp.lt.u32.totalorder %s1889_s23, %s2399_s7 }
   0x6   :  { %p1895_p2 = pnand %p1893_p1, %p1890_p0 }
   0x8   :  { %1898 = shalt.err (!%p1895_p2)
}
   0x9   :  { %s1899_s28 = scalar_lea.vmem %s48_s18, 1024  ;;  %p1904_p4 = scmp.lt.s32.totalorder %s48_s18, %s48_s18 }
   0xa   :  { %p1900_p3 = scmp.ne.s32.totalorder %s48_s18, %s1899_s28  ;;  %p1905_p5 = scmp.lt.s32.totalorder %s1899_s28, %s1899_s28 }
   0xc   :  { %p1906_p6 = por %p1905_p5, %p1904_p4 }
   0xe   :  { %p1907_p7 = pnand %p1906_p6, %p1900_p3 }
  0x10   :  { %1910 = shalt.err (!%p1907_p7)
}
  0x11   :  { %s1961_s29 = smov 64   ;;  %s1962_s30 = smov 4  }
  0x12   :  { %53 = dma.hbm_to_vmem [thread:$0]  %s2399_s7, 1024, %s48_s18, [#allocation5], %s1961_s29, %s1961_s29, %s1962_s30  }
  0x13   :  { %s1911_s16 = scalar_lea.hbm %s2395_s3, 2048 }
  0x14   :  { %p1912_p8 = scmp.ne.s32.totalorder %s2395_s3, %s1911_s16  ;;  %p1915_p9 = scmp.lt.u32.totalorder %s1911_s16, %s2395_s3 }
  0x16   :  { %p1917_p10 = pnand %p1915_p9, %p1912_p8 }
  0x18   :  { %1920 = shalt.err (!%p1917_p10)
}
  0x19   :  { %s1921_s23 = scalar_lea.vmem %s2025_s20, 2048  ;;  %p1926_p12 = scmp.lt.s32.totalorder %s2025_s20, %s2025_s20 }
  0x1a   :  { %p1922_p11 = scmp.ne.s32.totalorder %s2025_s20, %s1921_s23  ;;  %p1927_p13 = scmp.lt.s32.totalorder %s1921_s23, %s1921_s23 }
  0x1c   :  { %p1928_p0 = por %p1927_p13, %p1926_p12 }
  0x1e   :  { %p1929_p1 = pnand %p1928_p0, %p1922_p11 }
  0x20   :  { %1932 = shalt.err (!%p1929_p1)
}
  0x21   :  { %35 = dma.hbm_to_vmem [thread:$0]  %s2395_s3, 2048, %s2025_s20, [#allocation3], %s1961_s29, %s1961_s29, %s1962_s30  }
  0x22   :  { %s1963_s24 = smov [#allocation6]   ;;  %s1933_s28 = scalar_lea.hbm %s2401_s9, 1024 }
  0x23   :  { %s61_s25 = sshll.u32 %s1963_s24, 4  ;;  %p1934_p2 = scmp.ne.s32.totalorder %s2401_s9, %s1933_s28  ;;  %s62_s25 = int_to_ptr.vmem [resolvable:$true] %s61_s25 }
  0x24   :  { %p1937_p3 = scmp.lt.u32.totalorder %s1933_s28, %s2401_s9 }
  0x26   :  { %p1939_p4 = pnand %p1937_p3, %p1934_p2 }
  0x28   :  { %1942 = shalt.err (!%p1939_p4)
}
  0x29   :  { %s1943_s16 = scalar_lea.vmem %s62_s25, 1024  ;;  %p1948_p6 = scmp.lt.s32.totalorder %s62_s25, %s62_s25 }
  0x2a   :  { %p1944_p5 = scmp.ne.s32.totalorder %s62_s25, %s1943_s16  ;;  %p1949_p7 = scmp.lt.s32.totalorder %s1943_s16, %s1943_s16 }
  0x2c   :  { %p1950_p8 = por %p1949_p7, %p1948_p6 }
  0x2e   :  { %p1951_p9 = pnand %p1950_p8, %p1944_p5 }
  0x30   :  { %1954 = shalt.err (!%p1951_p9)
}
  0x31   :  { %67 = dma.hbm_to_vmem [thread:$0]  %s2401_s9, 1024, %s62_s25, [#allocation5], %s1961_s29, %s1961_s29, %s1962_s30  }
  0x32   :  { %1955 = dma.done.wait [#allocation3], 2048  }
  0x33   :  { %1956 = vsyncadd [#allocation3], 4294965248 }
  0x34   :  { %1957 = dma.done.wait [#allocation5], 2048  }
  0x35   :  { %1958 = vsyncadd [#allocation5], 4294965248  ;;  %v1964_v0 = vmov 0   ;;  %v1771_v1 = vld [vmem:[%s2393_s1 + $0x4] ss:$8 sps:$4 sm:$0xff]   ;;  %vm172_vm0 = vcmask 261120   ;;  %v102_v32 = vlaneseq }
  0x36   :  { %229 = vmatprep.mubr.bf16.mxu0 %v1964_v0  ;;  %v1773_v2 = vld [vmem:[%s2393_s1] ss:$8 sps:$4 sm:$0xff]   ;;  %197 = vmatprep.subr.bf16.mxu0 %v1771_v1  ;;  %v1774_v3 = vld [vmem:[%s2393_s1 + $0x14] ss:$8 sps:$4 sm:$0xff]   ;;  %v1776_v4 = vld [vmem:[%s2393_s1 + $0x10] ss:$8 sps:$4 sm:$0xff]  }
  0x37   :  { %198 = vmatpush1.bf16.msra.mxu0 %v1773_v2  ;;  %v1777_v5 = vld [vmem:[%s2392_s0] sm:$0xff]   ;;  %v1778_v7 = vld [vmem:[%s2392_s0 + $0x8] sm:$0xff]   ;;  %v1789_v11 = vld [vmem:[#allocation2 + $0x50] sm:$0xff]   ;;  %v103_v33 = vshrl.u32 %v102_v32, 7 }
  0x38   :  { %199 = vmatprep.subr.bf16.mxu0 %v1774_v3  ;;  %v1785_v6 = vld [vmem:[#allocation2 + $0x40] sm:$0xff]   ;;  %v1787_v9 = vld [vmem:[#allocation2 + $0x48] sm:$0xff]   ;;  %v1790_v12 = vld [vmem:[#allocation2 + $0x10] sm:$0xff]  }
  0x39   :  { %v1786_v8 = vld [vmem:[#allocation2] sm:$0xff]   ;;  %1557 = vmatprep.subr.bf16.mxu1 %v1785_v6  ;;  %v1788_v10 = vld [vmem:[#allocation2 + $0x8] sm:$0xff]   ;;  %v1791_v13 = vld [vmem:[#allocation2 + $0x58] sm:$0xff]   ;;  %v104_v34 = vsub.s32 0, %v103_v33  ;;  %v108_v36 = vsub.s32 1, %v103_v33 }
  0x3a   :  { %1558 = vmatpush3.bf16.msra.mxu1 %v1786_v8  ;;  %v1779_v14 = vld [vmem:[%s2392_s0 + $0x10] sm:$0xff]   ;;  %v1792_v15 = vld [vmem:[#allocation2 + $0x18] sm:$0xff]   ;;  %v1793_v16 = vld [vmem:[#allocation2 + $0x60] sm:$0xff]  }
  0x3b   :  { %200 = vmatpush1.bf16.msra.mxu0 %v1776_v4  ;;  %1559 = vmatprep.subr.bf16.mxu1 %v1787_v9  ;;  %v1794_v17 = vld [vmem:[#allocation2 + $0x20] sm:$0xff]   ;;  %v1780_v18 = vld [vmem:[%s2392_s0 + $0x18] sm:$0xff]   ;;  %v1782_v20 = vld [vmem:[%s2392_s0 + $0x28] sm:$0xff]  }
  0x3c   :  { %v1781_v19 = vld [vmem:[%s2392_s0 + $0x20] sm:$0xff]   ;;  %v1783_v21 = vld [vmem:[%s2392_s0 + $0x30] sm:$0xff]   ;;  %v1784_v22 = vld [vmem:[%s2392_s0 + $0x38] sm:$0xff]  }
  0x3d   :  { %v1795_v23 = vld [vmem:[#allocation2 + $0x68] sm:$0xff]   ;;  %v1797_v25 = vld [vmem:[#allocation2 + $0x70] sm:$0xff]   ;;  %v1799_v27 = vld [vmem:[#allocation2 + $0x78] sm:$0xff]  }
  0x3e   :  { %1505 = vmatmul.mubr.msk.bf16.vlgmr.msra.gmra.mrb[0].mxu0 %vm172_vm0, %v1777_v5  ;;  %1560 = vmatpush3.bf16.msra.mxu1 %v1788_v10  ;;  %v1796_v24 = vld [vmem:[#allocation2 + $0x28] sm:$0xff]   ;;  %v1798_v26 = vld [vmem:[#allocation2 + $0x30] sm:$0xff]   ;;  %v1800_v28 = vld [vmem:[#allocation2 + $0x38] sm:$0xff]  }
  0x3f   :  { %239 = vmatprep.mubr.bf16.mxu0 %v1964_v0  ;;  %1561 = vmatprep.subr.bf16.mxu1 %v1789_v11  ;;  %v1801_v29 = vld [vmem:[%s2397_s5] sm:$0xff]   ;;  %v1802_v30 = vld [vmem:[%s2397_s5 + $0x8] sm:$0xff]   ;;  %v1803_v31 = vld [vmem:[%s2397_s5 + $0x10] sm:$0xff]  }
  0x40   :  { %1669 = vmatprep.subr.bf16.mxu0 %v1801_v29  ;;  %v100_v35 = vld [vmem:[%s2394_s2] sm:$0x3] }
  0x41   :  { %1670 = vmatpush3.bf16.msra.mxu0 %v1801_v29  ;;  %v2133_v37 = vrot.slane %v100_v35, %v104_v34  ;;  %v2135_v38 = vrot.slane %v100_v35, %v108_v36 }
  0x42   :  { %1562 = vmatpush3.bf16.msra.mxu1 %v1790_v12  ;;  %1671 = vmatprep.subr.bf16.mxu0 %v1802_v30 }
  0x43   :  { %1563 = vmatprep.subr.bf16.mxu1 %v1791_v13 }
  0x45   :  { %1672 = vmatpush3.bf16.msra.mxu0 %v1802_v30 }
  0x46   :  { %1506 = vmatmul.mubr.msk.bf16.gmra.mrb[4].mxu0 %vm172_vm0, %v1778_v7  ;;  %1564 = vmatpush3.bf16.msra.mxu1 %v1792_v15 }
  0x47   :  { %249 = vmatprep.mubr.bf16.mxu0 %v1964_v0  ;;  %1565 = vmatprep.subr.bf16.mxu1 %v1793_v16 }
  0x48   :  { %1673 = vmatprep.subr.bf16.mxu0 %v1803_v31 }
  0x49   :  { %1674 = vmatpush3.bf16.msra.mxu0 %v1803_v31 }
  0x4a   :  { %1566 = vmatpush3.bf16.msra.mxu1 %v1794_v17 }
  0x4b   :  { %1567 = vmatprep.subr.bf16.mxu1 %v1795_v23 }
  0x4e   :  { %1507 = vmatmul.mubr.msk.bf16.gmra.mrb[8].mxu0 %vm172_vm0, %v1779_v14  ;;  %1568 = vmatpush3.bf16.msra.mxu1 %v1796_v24 }
  0x4f   :  { %259 = vmatprep.mubr.bf16.mxu0 %v1964_v0  ;;  %1569 = vmatprep.subr.bf16.mxu1 %v1797_v25 }
  0x52   :  { %1570 = vmatpush3.bf16.msra.mxu1 %v1798_v26 }
  0x53   :  { %1571 = vmatprep.subr.bf16.mxu1 %v1799_v27 }
  0x56   :  { %1508 = vmatmul.mubr.msk.bf16.gmra.mrb[12].mxu0 %vm172_vm0, %v1780_v18  ;;  %1572 = vmatpush3.bf16.msra.mxu1 %v1800_v28 }
  0x57   :  { %269 = vmatprep.mubr.bf16.mxu0 %v1964_v0 }
  0x5e   :  { %1509 = vmatmul.mubr.msk.bf16.gmra.mrb[16].mxu0 %vm172_vm0, %v1781_v19 }
  0x5f   :  { %279 = vmatprep.mubr.bf16.mxu0 %v1964_v0 }
  0x66   :  { %1510 = vmatmul.mubr.msk.bf16.gmra.mrb[20].mxu0 %vm172_vm0, %v1782_v20 }
  0x67   :  { %289 = vmatprep.mubr.bf16.mxu0 %v1964_v0 }
  0x6e   :  { %1511 = vmatmul.mubr.msk.bf16.gmra.mrb[24].mxu0 %vm172_vm0, %v1783_v21 }
  0x6f   :  { %299 = vmatprep.mubr.bf16.mxu0 %v1964_v0 }
  0x76   :  { %1512 = vmatmul.mubr.msk.bf16.gmra.mrb[28].mxu0 %vm172_vm0, %v1784_v22 }
 0x111   :  { %v231_v39 = vpop.f32.mrb[0].mxu0 }
 0x112   :  { %v232_v40 = vadd.f32 %v231_v39, %v2133_v37  ;;  %v233_v41 = vpop.f32.mrb[1].mxu0 }
 0x113   :  { %v234_v42 = vadd.f32 %v233_v41, %v2135_v38  ;;  %v235_v43 = vpop.f32.mrb[2].mxu0 }
 0x114   :  { %v342_v44 = vmul.f32 0.01, %v232_v40  ;;  %v236_v45 = vadd.f32 %v235_v43, %v2133_v37  ;;  %v237_v46 = vpop.f32.mrb[3].mxu0  ;;  %vm310_vm1 = vcmp.gt.f32.partialorder %v232_v40, 0.0 }
 0x115   :  { %v343_v47 = vmul.f32 0.01, %v234_v42  ;;  %v238_v48 = vadd.f32 %v237_v46, %v2135_v38  ;;  %vm311_vm3 = vcmp.gt.f32.partialorder %v234_v42, 0.0 }
 0x116   :  { %vm312_vm2 = vcmp.gt.f32.partialorder %v236_v45, 0.0  ;;  %v344_v49 = vmul.f32 0.01, %v236_v45  ;;  %v374_v51 = vsel %vm310_vm1, %v232_v40, %v342_v44 }
 0x117   :  { %v345_v50 = vmul.f32 0.01, %v238_v48  ;;  %vm313_vm4 = vcmp.gt.f32.partialorder %v238_v48, 0.0  ;;  %v375_v54 = vsel %vm311_vm3, %v234_v42, %v343_v47 }
 0x118   :  { %v376_v52 = vsel %vm312_vm2, %v236_v45, %v344_v49 }
 0x119   :  { %v241_v53 = vpop.f32.mrb[4].mxu0  ;;  %v377_v55 = vsel %vm313_vm4, %v238_v48, %v345_v50  ;;  %v406_v56 = vpack.c.bf16 %v376_v52, %v374_v51 }
 0x11a   :  { %v242_v57 = vadd.f32 %v241_v53, %v2133_v37  ;;  %v243_v58 = vpop.f32.mrb[5].mxu0  ;;  %v407_v59 = vpack.c.bf16 %v377_v55, %v375_v54 }
 0x11b   :  { %v244_v60 = vadd.f32 %v243_v58, %v2135_v38  ;;  %v245_v61 = vpop.f32.mrb[6].mxu0 }
 0x11c   :  { %v346_v62 = vmul.f32 0.01, %v242_v57  ;;  %v246_v63 = vadd.f32 %v245_v61, %v2133_v37  ;;  %v247_v0 = vpop.f32.mrb[7].mxu0  ;;  %589 = vmatprep.mubr.bf16.mxu1 %v407_v59  ;;  %vm314_vm5 = vcmp.gt.f32.partialorder %v242_v57, 0.0 }
 0x11d   :  { %v347_v1 = vmul.f32 0.01, %v244_v60  ;;  %v248_v2 = vadd.f32 %v247_v0, %v2135_v38  ;;  %590 = vmatmul.mubr.bf16.vlgmr.msra.gmra.mrb[0].mxu1 %v406_v56  ;;  %vm315_vm6 = vcmp.gt.f32.partialorder %v244_v60, 0.0 }
 0x11e   :  { %vm316_vm7 = vcmp.gt.f32.partialorder %v246_v63, 0.0  ;;  %v348_v3 = vmul.f32 0.01, %v246_v63  ;;  %v378_v5 = vsel %vm314_vm5, %v242_v57, %v346_v62 }
 0x11f   :  { %vm317_vm8 = vcmp.gt.f32.partialorder %v248_v2, 0.0  ;;  %v349_v4 = vmul.f32 0.01, %v248_v2  ;;  %v379_v8 = vsel %vm315_vm6, %v244_v60, %v347_v1 }
 0x120   :  { %v380_v6 = vsel %vm316_vm7, %v246_v63, %v348_v3 }
 0x121   :  { %v251_v7 = vpop.f32.mrb[8].mxu0  ;;  %v381_v9 = vsel %vm317_vm8, %v248_v2, %v349_v4  ;;  %v408_v10 = vpack.c.bf16 %v380_v6, %v378_v5 }
 0x122   :  { %v252_v11 = vadd.f32 %v251_v7, %v2133_v37  ;;  %v253_v12 = vpop.f32.mrb[9].mxu0  ;;  %v409_v13 = vpack.c.bf16 %v381_v9, %v379_v8 }
 0x123   :  { %v254_v14 = vadd.f32 %v253_v12, %v2135_v38  ;;  %v255_v15 = vpop.f32.mrb[10].mxu0 }
 0x124   :  { %v350_v16 = vmul.f32 0.01, %v252_v11  ;;  %v256_v17 = vadd.f32 %v255_v15, %v2133_v37  ;;  %v257_v18 = vpop.f32.mrb[11].mxu0  ;;  %597 = vmatprep.mubr.bf16.mxu1 %v409_v13  ;;  %vm318_vm9 = vcmp.gt.f32.partialorder %v252_v11, 0.0 }
 0x125   :  { %v351_v19 = vmul.f32 0.01, %v254_v14  ;;  %v258_v20 = vadd.f32 %v257_v18, %v2135_v38  ;;  %598 = vmatmul.mubr.bf16.gmra.mrb[4].mxu1 %v408_v10  ;;  %vm319_vm10 = vcmp.gt.f32.partialorder %v254_v14, 0.0 }
 0x126   :  { %vm320_vm11 = vcmp.gt.f32.partialorder %v256_v17, 0.0  ;;  %v352_v21 = vmul.f32 0.01, %v256_v17  ;;  %v382_v23 = vsel %vm318_vm9, %v252_v11, %v350_v16 }
 0x127   :  { %vm321_vm12 = vcmp.gt.f32.partialorder %v258_v20, 0.0  ;;  %v353_v22 = vmul.f32 0.01, %v258_v20  ;;  %v383_v26 = vsel %vm319_vm10, %v254_v14, %v351_v19 }
 0x128   :  { %v384_v24 = vsel %vm320_vm11, %v256_v17, %v352_v21 }
 0x129   :  { %v261_v25 = vpop.f32.mrb[12].mxu0  ;;  %v385_v27 = vsel %vm321_vm12, %v258_v20, %v353_v22  ;;  %v410_v28 = vpack.c.bf16 %v384_v24, %v382_v23 }
 0x12a   :  { %v262_v29 = vadd.f32 %v261_v25, %v2133_v37  ;;  %v263_v30 = vpop.f32.mrb[13].mxu0  ;;  %v411_v31 = vpack.c.bf16 %v385_v27, %v383_v26 }
 0x12b   :  { %v264_v32 = vadd.f32 %v263_v30, %v2135_v38  ;;  %v265_v33 = vpop.f32.mrb[14].mxu0 }
 0x12c   :  { %v354_v34 = vmul.f32 0.01, %v262_v29  ;;  %v266_v35 = vadd.f32 %v265_v33, %v2133_v37  ;;  %v267_v36 = vpop.f32.mrb[15].mxu0  ;;  %605 = vmatprep.mubr.bf16.mxu1 %v411_v31  ;;  %vm322_vm13 = vcmp.gt.f32.partialorder %v262_v29, 0.0 }
 0x12d   :  { %v355_v39 = vmul.f32 0.01, %v264_v32  ;;  %v268_v40 = vadd.f32 %v267_v36, %v2135_v38  ;;  %606 = vmatmul.mubr.bf16.gmra.mrb[8].mxu1 %v410_v28  ;;  %vm323_vm14 = vcmp.gt.f32.partialorder %v264_v32, 0.0 }
 0x12e   :  { %vm324_vm15 = vcmp.gt.f32.partialorder %v266_v35, 0.0  ;;  %v356_v41 = vmul.f32 0.01, %v266_v35  ;;  %v386_v43 = vsel %vm322_vm13, %v262_v29, %v354_v34 }
 0x12f   :  { %vm325_vm0 = vcmp.gt.f32.partialorder %v268_v40, 0.0  ;;  %v357_v42 = vmul.f32 0.01, %v268_v40  ;;  %v387_v46 = vsel %vm323_vm14, %v264_v32, %v355_v39 }
 0x130   :  { %v388_v44 = vsel %vm324_vm15, %v266_v35, %v356_v41 }
 0x131   :  { %v271_v45 = vpop.f32.mrb[16].mxu0  ;;  %v389_v47 = vsel %vm325_vm0, %v268_v40, %v357_v42  ;;  %v412_v48 = vpack.c.bf16 %v388_v44, %v386_v43 }
 0x132   :  { %v272_v49 = vadd.f32 %v271_v45, %v2133_v37  ;;  %v273_v50 = vpop.f32.mrb[17].mxu0  ;;  %v413_v51 = vpack.c.bf16 %v389_v47, %v387_v46 }
 0x133   :  { %v274_v52 = vadd.f32 %v273_v50, %v2135_v38  ;;  %v275_v53 = vpop.f32.mrb[18].mxu0 }
 0x134   :  { %v358_v54 = vmul.f32 0.01, %v272_v49  ;;  %v276_v55 = vadd.f32 %v275_v53, %v2133_v37  ;;  %v277_v56 = vpop.f32.mrb[19].mxu0  ;;  %613 = vmatprep.mubr.bf16.mxu1 %v413_v51  ;;  %vm326_vm1 = vcmp.gt.f32.partialorder %v272_v49, 0.0 }
 0x135   :  { %v359_v57 = vmul.f32 0.01, %v274_v52  ;;  %v278_v58 = vadd.f32 %v277_v56, %v2135_v38  ;;  %614 = vmatmul.mubr.bf16.gmra.mrb[12].mxu1 %v412_v48  ;;  %vm327_vm2 = vcmp.gt.f32.partialorder %v274_v52, 0.0 }
 0x136   :  { %vm328_vm3 = vcmp.gt.f32.partialorder %v276_v55, 0.0  ;;  %v360_v59 = vmul.f32 0.01, %v276_v55  ;;  %v390_v61 = vsel %vm326_vm1, %v272_v49, %v358_v54 }
 0x137   :  { %vm329_vm4 = vcmp.gt.f32.partialorder %v278_v58, 0.0  ;;  %v361_v60 = vmul.f32 0.01, %v278_v58  ;;  %v391_v0 = vsel %vm327_vm2, %v274_v52, %v359_v57 }
 0x138   :  { %v392_v62 = vsel %vm328_vm3, %v276_v55, %v360_v59  ;;  %v1806_v59 = vld [vmem:[%s2397_s5 + $0x28] sm:$0xff]  }
 0x139   :  { %v281_v63 = vpop.f32.mrb[20].mxu0  ;;  %v393_v1 = vsel %vm329_vm4, %v278_v58, %v361_v60  ;;  %v414_v2 = vpack.c.bf16 %v392_v62, %v390_v61  ;;  %v1807_v60 = vld [vmem:[%s2397_s5 + $0x30] sm:$0xff]   ;;  %v1808_v61 = vld [vmem:[%s2397_s5 + $0x38] sm:$0xff]   ;;  %v1809_v62 = vld [vmem:[#allocation4] sm:$0xff]  }
 0x13a   :  { %v282_v3 = vadd.f32 %v281_v63, %v2133_v37  ;;  %v283_v4 = vpop.f32.mrb[21].mxu0  ;;  %v415_v5 = vpack.c.bf16 %v393_v1, %v391_v0  ;;  %v1810_v63 = vld [vmem:[#allocation4 + $0x8] sm:$0xff]   ;;  %1701 = vmatprep.subr.bf16.mxu1 %v1809_v62  ;;  %v1811_v0 = vld [vmem:[#allocation4 + $0x10] sm:$0xff]   ;;  %v1812_v1 = vld [vmem:[#allocation4 + $0x18] sm:$0xff]  }
 0x13b   :  { %v284_v6 = vadd.f32 %v283_v4, %v2135_v38  ;;  %v285_v7 = vpop.f32.mrb[22].mxu0  ;;  %1702 = vmatpush3.bf16.msra.mxu1 %v1809_v62  ;;  %v2187_v4 = vld [vmem:[%s2396_s4] ss:$0 sm:$0xff] }
 0x13c   :  { %v362_v8 = vmul.f32 0.01, %v282_v3  ;;  %v286_v9 = vadd.f32 %v285_v7, %v2133_v37  ;;  %v287_v10 = vpop.f32.mrb[23].mxu0  ;;  %621 = vmatprep.mubr.bf16.mxu1 %v415_v5  ;;  %vm330_vm5 = vcmp.gt.f32.partialorder %v282_v3, 0.0  ;;  %1703 = vmatprep.subr.bf16.mxu1 %v1810_v63 }
 0x13d   :  { %v363_v11 = vmul.f32 0.01, %v284_v6  ;;  %v288_v12 = vadd.f32 %v287_v10, %v2135_v38  ;;  %622 = vmatmul.mubr.bf16.gmra.mrb[16].mxu1 %v414_v2  ;;  %vm331_vm6 = vcmp.gt.f32.partialorder %v284_v6, 0.0  ;;  %v1813_v2 = vld [vmem:[#allocation4 + $0x20] sm:$0xff]  }
 0x13e   :  { %vm332_vm7 = vcmp.gt.f32.partialorder %v286_v9, 0.0  ;;  %v364_v13 = vmul.f32 0.01, %v286_v9  ;;  %v394_v15 = vsel %vm330_vm5, %v282_v3, %v362_v8 }
 0x13f   :  { %vm333_vm8 = vcmp.gt.f32.partialorder %v288_v12, 0.0  ;;  %v365_v14 = vmul.f32 0.01, %v288_v12  ;;  %v395_v18 = vsel %vm331_vm6, %v284_v6, %v363_v11  ;;  %1704 = vmatpush3.bf16.msra.mxu1 %v1810_v63 }
 0x140   :  { %v396_v16 = vsel %vm332_vm7, %v286_v9, %v364_v13  ;;  %1705 = vmatprep.subr.bf16.mxu1 %v1811_v0 }
 0x141   :  { %v291_v17 = vpop.f32.mrb[24].mxu0  ;;  %v397_v19 = vsel %vm333_vm8, %v288_v12, %v365_v14  ;;  %v416_v20 = vpack.c.bf16 %v396_v16, %v394_v15 }
 0x142   :  { %v292_v21 = vadd.f32 %v291_v17, %v2133_v37  ;;  %v293_v22 = vpop.f32.mrb[25].mxu0  ;;  %v417_v23 = vpack.c.bf16 %v397_v19, %v395_v18 }
 0x143   :  { %v294_v24 = vadd.f32 %v293_v22, %v2135_v38  ;;  %v295_v25 = vpop.f32.mrb[26].mxu0  ;;  %1706 = vmatpush3.bf16.msra.mxu1 %v1811_v0 }
 0x144   :  { %v366_v26 = vmul.f32 0.01, %v292_v21  ;;  %v296_v27 = vadd.f32 %v295_v25, %v2133_v37  ;;  %v297_v28 = vpop.f32.mrb[27].mxu0  ;;  %629 = vmatprep.mubr.bf16.mxu1 %v417_v23  ;;  %vm334_vm9 = vcmp.gt.f32.partialorder %v292_v21, 0.0  ;;  %1707 = vmatprep.subr.bf16.mxu1 %v1812_v1 }
 0x145   :  { %v367_v29 = vmul.f32 0.01, %v294_v24  ;;  %v298_v30 = vadd.f32 %v297_v28, %v2135_v38  ;;  %630 = vmatmul.mubr.bf16.gmra.mrb[20].mxu1 %v416_v20  ;;  %vm335_vm10 = vcmp.gt.f32.partialorder %v294_v24, 0.0 }
 0x146   :  { %vm336_vm11 = vcmp.gt.f32.partialorder %v296_v27, 0.0  ;;  %v368_v31 = vmul.f32 0.01, %v296_v27  ;;  %v398_v33 = vsel %vm334_vm9, %v292_v21, %v366_v26 }
 0x147   :  { %vm337_vm12 = vcmp.gt.f32.partialorder %v298_v30, 0.0  ;;  %v369_v32 = vmul.f32 0.01, %v298_v30  ;;  %v399_v36 = vsel %vm335_vm10, %v294_v24, %v367_v29  ;;  %1708 = vmatpush3.bf16.msra.mxu1 %v1812_v1 }
 0x148   :  { %v400_v34 = vsel %vm336_vm11, %v296_v27, %v368_v31  ;;  %1709 = vmatprep.subr.bf16.mxu1 %v1813_v2 }
 0x149   :  { %v301_v35 = vpop.f32.mrb[28].mxu0  ;;  %v401_v39 = vsel %vm337_vm12, %v298_v30, %v369_v32  ;;  %v418_v40 = vpack.c.bf16 %v400_v34, %v398_v33 }
 0x14a   :  { %v302_v41 = vadd.f32 %v301_v35, %v2133_v37  ;;  %v303_v42 = vpop.f32.mrb[29].mxu0  ;;  %v419_v43 = vpack.c.bf16 %v401_v39, %v399_v36 }
 0x14b   :  { %v304_v44 = vadd.f32 %v303_v42, %v2135_v38  ;;  %v305_v45 = vpop.f32.mrb[30].mxu0  ;;  %1710 = vmatpush3.bf16.msra.mxu1 %v1813_v2 }
 0x14c   :  { %v370_v46 = vmul.f32 0.01, %v302_v41  ;;  %v306_v47 = vadd.f32 %v305_v45, %v2133_v37  ;;  %v307_v48 = vpop.f32.mrb[31].mxu0  ;;  %637 = vmatprep.mubr.bf16.mxu1 %v419_v43  ;;  %vm338_vm13 = vcmp.gt.f32.partialorder %v302_v41, 0.0  ;;  %v1804_v37 = vld [vmem:[%s2397_s5 + $0x18] sm:$0xff]  }
 0x14d   :  { %v371_v49 = vmul.f32 0.01, %v304_v44  ;;  %v308_v50 = vadd.f32 %v307_v48, %v2135_v38  ;;  %638 = vmatmul.mubr.bf16.gmra.mrb[24].mxu1 %v418_v40  ;;  %vm339_vm14 = vcmp.gt.f32.partialorder %v304_v44, 0.0  ;;  %1675 = vmatprep.subr.bf16.mxu0 %v1804_v37  ;;  %v1805_v38 = vld [vmem:[%s2397_s5 + $0x20] sm:$0xff]  }
 0x14e   :  { %vm340_vm15 = vcmp.gt.f32.partialorder %v306_v47, 0.0  ;;  %v372_v51 = vmul.f32 0.01, %v306_v47  ;;  %v402_v53 = vsel %vm338_vm13, %v302_v41, %v370_v46  ;;  %1676 = vmatpush3.bf16.msra.mxu0 %v1804_v37 }
 0x14f   :  { %vm341_vm0 = vcmp.gt.f32.partialorder %v308_v50, 0.0  ;;  %v373_v52 = vmul.f32 0.01, %v308_v50  ;;  %v403_v55 = vsel %vm339_vm14, %v304_v44, %v371_v49  ;;  %1677 = vmatprep.subr.bf16.mxu0 %v1805_v38 }
 0x150   :  { %v404_v54 = vsel %vm340_vm15, %v306_v47, %v372_v51 }
 0x151   :  { %v405_v56 = vsel %vm341_vm0, %v308_v50, %v373_v52  ;;  %v420_v57 = vpack.c.bf16 %v404_v54, %v402_v53 }
 0x152   :  { %v421_v58 = vpack.c.bf16 %v405_v56, %v403_v55  ;;  %1678 = vmatpush3.bf16.msra.mxu0 %v1805_v38 }
 0x153   :  { %1679 = vmatprep.subr.bf16.mxu0 %v1806_v59 }
 0x154   :  { %645 = vmatprep.mubr.bf16.mxu1 %v421_v58 }
 0x155   :  { %646 = vmatmul.mubr.bf16.gmra.mrb[28].mxu1 %v420_v57 }
 0x156   :  { %1680 = vmatpush3.bf16.msra.mxu0 %v1806_v59 }
 0x157   :  { %1681 = vmatprep.subr.bf16.mxu0 %v1807_v60 }
 0x15a   :  { %1682 = vmatpush3.bf16.msra.mxu0 %v1807_v60 }
 0x15b   :  { %1683 = vmatprep.subr.bf16.mxu0 %v1808_v61 }
 0x15e   :  { %1684 = vmatpush3.bf16.msra.mxu0 %v1808_v61 }
 0x1f0   :  { %v1573_v3 = vpop.f32.mrb[0].mxu1 }
 0x1f1   :  { %v1574_v5 = vpop.f32.mrb[1].mxu1 }
 0x1f2   :  { %v1575_v6 = vadd.f32 %v1574_v5, %v1573_v3  ;;  %v1576_v7 = vpop.f32.mrb[2].mxu1 }
 0x1f3   :  { %v1577_v8 = vpop.f32.mrb[3].mxu1 }
 0x1f4   :  { %v592_v9 = vadd.f32 %v1575_v6, %v2187_v4  ;;  %v1578_v10 = vadd.f32 %v1577_v8, %v1576_v7 }
 0x1f6   :  { %v670_v11 = vmul.f32 0.01, %v592_v9  ;;  %v595_v12 = vadd.f32 %v1578_v10, %v2187_v4  ;;  %vm654_vm1 = vcmp.gt.f32.partialorder %v592_v9, 0.0 }
 0x1f8   :  { %vm655_vm2 = vcmp.gt.f32.partialorder %v595_v12, 0.0  ;;  %v671_v13 = vmul.f32 0.01, %v595_v12  ;;  %v1579_v14 = vpop.f32.mrb[4].mxu1  ;;  %v686_v18 = vsel %vm654_vm1, %v592_v9, %v670_v11 }
 0x1f9   :  { %v1580_v15 = vpop.f32.mrb[5].mxu1 }
 0x1fa   :  { %v1581_v16 = vadd.f32 %v1580_v15, %v1579_v14  ;;  %v1582_v17 = vpop.f32.mrb[6].mxu1  ;;  %v687_v19 = vsel %vm655_vm2, %v595_v12, %v671_v13 }
 0x1fb   :  { %v1583_v20 = vpop.f32.mrb[7].mxu1  ;;  %v702_v21 = vpack.c.bf16 %v687_v19, %v686_v18 }
 0x1fc   :  { %v600_v22 = vadd.f32 %v1581_v16, %v2187_v4  ;;  %v1584_v23 = vadd.f32 %v1583_v20, %v1582_v17 }
 0x1fd   :  { %1685 = vmatprep.mubr.bf16.mxu0 %v702_v21 }
 0x1fe   :  { %v672_v24 = vmul.f32 0.01, %v600_v22  ;;  %v603_v25 = vadd.f32 %v1584_v23, %v2187_v4  ;;  %vm656_vm3 = vcmp.gt.f32.partialorder %v600_v22, 0.0 }
 0x200   :  { %vm657_vm4 = vcmp.gt.f32.partialorder %v603_v25, 0.0  ;;  %v673_v26 = vmul.f32 0.01, %v603_v25  ;;  %v1585_v27 = vpop.f32.mrb[8].mxu1  ;;  %v688_v29 = vsel %vm656_vm3, %v600_v22, %v672_v24 }
 0x201   :  { %v1586_v28 = vpop.f32.mrb[9].mxu1 }
 0x202   :  { %v689_v30 = vsel %vm657_vm4, %v603_v25, %v673_v26  ;;  %v1587_v31 = vadd.f32 %v1586_v28, %v1585_v27  ;;  %v1588_v32 = vpop.f32.mrb[10].mxu1 }
 0x203   :  { %v703_v33 = vpack.c.bf16 %v689_v30, %v688_v29  ;;  %v1589_v34 = vpop.f32.mrb[11].mxu1 }
 0x204   :  { %v608_v35 = vadd.f32 %v1587_v31, %v2187_v4  ;;  %v1590_v36 = vadd.f32 %v1589_v34, %v1588_v32 }
 0x205   :  { %1686 = vmatmul.mubr.bf16.vlgmr.msra.gmra.mrb[32].mxu0 %v703_v33 }
 0x206   :  { %v674_v39 = vmul.f32 0.01, %v608_v35  ;;  %v611_v40 = vadd.f32 %v1590_v36, %v2187_v4  ;;  %vm658_vm5 = vcmp.gt.f32.partialorder %v608_v35, 0.0 }
 0x208   :  { %vm659_vm6 = vcmp.gt.f32.partialorder %v611_v40, 0.0  ;;  %v675_v41 = vmul.f32 0.01, %v611_v40  ;;  %v1591_v42 = vpop.f32.mrb[12].mxu1  ;;  %v690_v46 = vsel %vm658_vm5, %v608_v35, %v674_v39 }
 0x209   :  { %v1592_v43 = vpop.f32.mrb[13].mxu1 }
 0x20a   :  { %v1593_v44 = vadd.f32 %v1592_v43, %v1591_v42  ;;  %v1594_v45 = vpop.f32.mrb[14].mxu1  ;;  %v691_v47 = vsel %vm659_vm6, %v611_v40, %v675_v41 }
 0x20b   :  { %v1595_v48 = vpop.f32.mrb[15].mxu1  ;;  %v704_v49 = vpack.c.bf16 %v691_v47, %v690_v46  ;;  %v1814_v47 = vld [vmem:[#allocation4 + $0x28] sm:$0xff]  }
 0x20c   :  { %v616_v50 = vadd.f32 %v1593_v44, %v2187_v4  ;;  %v1596_v51 = vadd.f32 %v1595_v48, %v1594_v45  ;;  %1711 = vmatprep.subr.bf16.mxu1 %v1814_v47  ;;  %v1815_v48 = vld [vmem:[#allocation4 + $0x30] sm:$0xff]  }
 0x20d   :  { %1689 = vmatprep.mubr.bf16.mxu0 %v704_v49  ;;  %1712 = vmatpush3.bf16.msra.mxu1 %v1814_v47  ;;  %v1816_v49 = vld [vmem:[#allocation4 + $0x38] sm:$0xff]  }
 0x20e   :  { %v676_v52 = vmul.f32 0.01, %v616_v50  ;;  %v619_v53 = vadd.f32 %v1596_v51, %v2187_v4  ;;  %vm660_vm7 = vcmp.gt.f32.partialorder %v616_v50, 0.0  ;;  %1713 = vmatprep.subr.bf16.mxu1 %v1815_v48  ;;  %v1818_v51 = vld [vmem:[#allocation6 + $0x8] sm:$0xff]  }
 0x210   :  { %vm661_vm8 = vcmp.gt.f32.partialorder %v619_v53, 0.0  ;;  %v677_v54 = vmul.f32 0.01, %v619_v53  ;;  %v1597_v55 = vpop.f32.mrb[16].mxu1  ;;  %v692_v37 = vsel %vm660_vm7, %v616_v50, %v676_v52  ;;  %v1817_v50 = vld [vmem:[#allocation6] sm:$0xff]   ;;  %v1820_v52 = vld [vmem:[#allocation6 + $0x18] sm:$0xff]  }
 0x211   :  { %v1598_v56 = vpop.f32.mrb[17].mxu1  ;;  %1714 = vmatpush3.bf16.msra.mxu1 %v1815_v48  ;;  %1733 = vmatprep.subr.bf16.mxu0 %v1817_v50 }
 0x212   :  { %v1599_v57 = vadd.f32 %v1598_v56, %v1597_v55  ;;  %v1600_v58 = vpop.f32.mrb[18].mxu1  ;;  %v693_v38 = vsel %vm661_vm8, %v619_v53, %v677_v54  ;;  %1715 = vmatprep.subr.bf16.mxu1 %v1816_v49  ;;  %1734 = vmatpush3.bf16.msra.mxu0 %v1817_v50  ;;  %v1821_v53 = vld [vmem:[#allocation6 + $0x20] sm:$0xff]  }
 0x213   :  { %v1601_v59 = vpop.f32.mrb[19].mxu1  ;;  %v705_v60 = vpack.c.bf16 %v693_v38, %v692_v37  ;;  %1735 = vmatprep.subr.bf16.mxu0 %v1818_v51  ;;  %v2208_v54 = vld [vmem:[%s2398_s6] ss:$0 sm:$0xff] }
 0x214   :  { %v624_v61 = vadd.f32 %v1599_v57, %v2187_v4  ;;  %v1602_v62 = vadd.f32 %v1601_v59, %v1600_v58 }
 0x215   :  { %1690 = vmatmul.mubr.bf16.gmra.mrb[36].mxu0 %v705_v60  ;;  %1716 = vmatpush3.bf16.msra.mxu1 %v1816_v49 }
 0x216   :  { %v678_v63 = vmul.f32 0.01, %v624_v61  ;;  %v627_v0 = vadd.f32 %v1602_v62, %v2187_v4  ;;  %vm662_vm9 = vcmp.gt.f32.partialorder %v624_v61, 0.0  ;;  %1736 = vmatpush3.bf16.msra.mxu0 %v1818_v51 }
 0x218   :  { %vm663_vm10 = vcmp.gt.f32.partialorder %v627_v0, 0.0  ;;  %v679_v1 = vmul.f32 0.01, %v627_v0  ;;  %v1603_v2 = vpop.f32.mrb[20].mxu1  ;;  %v694_v7 = vsel %vm662_vm9, %v624_v61, %v678_v63 }
 0x219   :  { %v1604_v3 = vpop.f32.mrb[21].mxu1 }
 0x21a   :  { %v1605_v5 = vadd.f32 %v1604_v3, %v1603_v2  ;;  %v1606_v6 = vpop.f32.mrb[22].mxu1  ;;  %v695_v8 = vsel %vm663_vm10, %v627_v0, %v679_v1 }
 0x21b   :  { %v1607_v9 = vpop.f32.mrb[23].mxu1  ;;  %v706_v10 = vpack.c.bf16 %v695_v8, %v694_v7 }
 0x21c   :  { %v632_v11 = vadd.f32 %v1605_v5, %v2187_v4  ;;  %v1608_v12 = vadd.f32 %v1607_v9, %v1606_v6 }
 0x21d   :  { %1693 = vmatprep.mubr.bf16.mxu0 %v706_v10 }
 0x21e   :  { %v680_v13 = vmul.f32 0.01, %v632_v11  ;;  %v635_v14 = vadd.f32 %v1608_v12, %v2187_v4  ;;  %vm664_vm11 = vcmp.gt.f32.partialorder %v632_v11, 0.0 }
 0x220   :  { %vm665_vm12 = vcmp.gt.f32.partialorder %v635_v14, 0.0  ;;  %v681_v15 = vmul.f32 0.01, %v635_v14  ;;  %v1609_v16 = vpop.f32.mrb[24].mxu1  ;;  %v696_v20 = vsel %vm664_vm11, %v632_v11, %v680_v13 }
 0x221   :  { %v1610_v17 = vpop.f32.mrb[25].mxu1 }
 0x222   :  { %v1611_v18 = vadd.f32 %v1610_v17, %v1609_v16  ;;  %v1612_v19 = vpop.f32.mrb[26].mxu1  ;;  %v697_v21 = vsel %vm665_vm12, %v635_v14, %v681_v15 }
 0x223   :  { %v1613_v22 = vpop.f32.mrb[27].mxu1  ;;  %v707_v23 = vpack.c.bf16 %v697_v21, %v696_v20 }
 0x224   :  { %v640_v24 = vadd.f32 %v1611_v18, %v2187_v4  ;;  %v1614_v25 = vadd.f32 %v1613_v22, %v1612_v19 }
 0x225   :  { %1694 = vmatmul.mubr.bf16.gmra.mrb[40].mxu0 %v707_v23 }
 0x226   :  { %v682_v26 = vmul.f32 0.01, %v640_v24  ;;  %v643_v27 = vadd.f32 %v1614_v25, %v2187_v4  ;;  %vm666_vm13 = vcmp.gt.f32.partialorder %v640_v24, 0.0 }
 0x228   :  { %vm667_vm14 = vcmp.gt.f32.partialorder %v643_v27, 0.0  ;;  %v683_v28 = vmul.f32 0.01, %v643_v27  ;;  %v1615_v29 = vpop.f32.mrb[28].mxu1  ;;  %v698_v33 = vsel %vm666_vm13, %v640_v24, %v682_v26 }
 0x229   :  { %v1616_v30 = vpop.f32.mrb[29].mxu1 }
 0x22a   :  { %v1617_v31 = vadd.f32 %v1616_v30, %v1615_v29  ;;  %v1618_v32 = vpop.f32.mrb[30].mxu1  ;;  %v699_v34 = vsel %vm667_vm14, %v643_v27, %v683_v28 }
 0x22b   :  { %v1619_v35 = vpop.f32.mrb[31].mxu1  ;;  %v708_v36 = vpack.c.bf16 %v699_v34, %v698_v33 }
 0x22c   :  { %v648_v39 = vadd.f32 %v1617_v31, %v2187_v4  ;;  %v1620_v40 = vadd.f32 %v1619_v35, %v1618_v32 }
 0x22d   :  { %1697 = vmatprep.mubr.bf16.mxu0 %v708_v36 }
 0x22e   :  { %v684_v41 = vmul.f32 0.01, %v648_v39  ;;  %v651_v42 = vadd.f32 %v1620_v40, %v2187_v4  ;;  %vm668_vm15 = vcmp.gt.f32.partialorder %v648_v39, 0.0  ;;  %v1819_v4 = vld [vmem:[#allocation6 + $0x10] sm:$0xff]  }
 0x22f   :  { %1737 = vmatprep.subr.bf16.mxu0 %v1819_v4 }
 0x230   :  { %vm669_vm0 = vcmp.gt.f32.partialorder %v651_v42, 0.0  ;;  %v685_v43 = vmul.f32 0.01, %v651_v42  ;;  %v700_v44 = vsel %vm668_vm15, %v648_v39, %v684_v41  ;;  %1738 = vmatpush3.bf16.msra.mxu0 %v1819_v4 }
 0x231   :  { %1739 = vmatprep.subr.bf16.mxu0 %v1820_v52 }
 0x232   :  { %v701_v45 = vsel %vm669_vm0, %v651_v42, %v685_v43 }
 0x233   :  { %v709_v46 = vpack.c.bf16 %v701_v45, %v700_v44 }
 0x234   :  { %1740 = vmatpush3.bf16.msra.mxu0 %v1820_v52 }
 0x235   :  { %1698 = vmatmul.mubr.bf16.gmra.mrb[44].mxu0 %v709_v46  ;;  %1741 = vmatprep.subr.bf16.mxu0 %v1821_v53 }
 0x238   :  { %1742 = vmatpush3.bf16.msra.mxu0 %v1821_v53 }
 0x2d8   :  { %v1687_v55 = vpop.f32.mrb[32].mxu0 }
 0x2d9   :  { %v824_v56 = vadd.f32 %v1687_v55, %v2208_v54  ;;  %v815_v57 = vpop.f32.mrb[33].mxu0 }
 0x2da   :  { %v816_v58 = vadd.f32 %v2208_v54, %v815_v57  ;;  %v1688_v37 = vpop.f32.mrb[34].mxu0 }
 0x2db   :  { %v896_v38 = vmul.f32 0.01, %v824_v56  ;;  %v827_v59 = vadd.f32 %v1688_v37, %v2208_v54  ;;  %v818_v60 = vpop.f32.mrb[35].mxu0  ;;  %vm880_vm1 = vcmp.gt.f32.partialorder %v824_v56, 0.0 }
 0x2dc   :  { %v894_v61 = vmul.f32 0.01, %v816_v58  ;;  %v819_v62 = vadd.f32 %v2208_v54, %v818_v60  ;;  %vm878_vm2 = vcmp.gt.f32.partialorder %v816_v58, 0.0 }
 0x2dd   :  { %vm881_vm3 = vcmp.gt.f32.partialorder %v827_v59, 0.0  ;;  %v897_v63 = vmul.f32 0.01, %v827_v59  ;;  %v912_v1 = vsel %vm880_vm1, %v824_v56, %v896_v38 }
 0x2de   :  { %vm879_vm4 = vcmp.gt.f32.partialorder %v819_v62, 0.0  ;;  %v895_v0 = vmul.f32 0.01, %v819_v62  ;;  %v910_v5 = vsel %vm878_vm2, %v816_v58, %v894_v61 }
 0x2df   :  { %v913_v2 = vsel %vm881_vm3, %v827_v59, %v897_v63  ;;  %v1823_v63 = vld [vmem:[#allocation6 + $0x30] sm:$0xff]  }
 0x2e0   :  { %v927_v3 = vpack.c.bf16 %v913_v2, %v912_v1  ;;  %v911_v6 = vsel %vm879_vm4, %v819_v62, %v895_v0  ;;  %v1822_v62 = vld [vmem:[#allocation6 + $0x28] sm:$0xff]   ;;  %v2229_v0 = vld [vmem:[%s2400_s8] ss:$0 sm:$0xff] }
 0x2e1   :  { %v926_v7 = vpack.c.bf16 %v911_v6, %v910_v5  ;;  %1743 = vmatprep.subr.bf16.mxu0 %v1822_v62 }
 0x2e2   :  { %1744 = vmatpush3.bf16.msra.mxu0 %v1822_v62 }
 0x2e3   :  { %1717 = vmatprep.mubr.bf16.mxu1 %v926_v7  ;;  %1745 = vmatprep.subr.bf16.mxu0 %v1823_v63 }
 0x2e4   :  { %1718 = vmatmul.mubr.bf16.vlgmr.msra.gmra.mrb[32].mxu1 %v927_v3 }
 0x2e6   :  { %1746 = vmatpush3.bf16.msra.mxu0 %v1823_v63 }
 0x2e8   :  { %v1691_v8 = vpop.f32.mrb[36].mxu0 }
 0x2e9   :  { %v840_v9 = vadd.f32 %v1691_v8, %v2208_v54  ;;  %v831_v10 = vpop.f32.mrb[37].mxu0 }
 0x2ea   :  { %v832_v11 = vadd.f32 %v2208_v54, %v831_v10  ;;  %v1692_v12 = vpop.f32.mrb[38].mxu0 }
 0x2eb   :  { %v900_v13 = vmul.f32 0.01, %v840_v9  ;;  %v843_v14 = vadd.f32 %v1692_v12, %v2208_v54  ;;  %v834_v15 = vpop.f32.mrb[39].mxu0  ;;  %vm884_vm5 = vcmp.gt.f32.partialorder %v840_v9, 0.0 }
 0x2ec   :  { %v898_v16 = vmul.f32 0.01, %v832_v11  ;;  %v835_v17 = vadd.f32 %v2208_v54, %v834_v15  ;;  %vm882_vm6 = vcmp.gt.f32.partialorder %v832_v11, 0.0 }
 0x2ed   :  { %vm885_vm7 = vcmp.gt.f32.partialorder %v843_v14, 0.0  ;;  %v901_v18 = vmul.f32 0.01, %v843_v14  ;;  %v916_v20 = vsel %vm884_vm5, %v840_v9, %v900_v13 }
 0x2ee   :  { %vm883_vm8 = vcmp.gt.f32.partialorder %v835_v17, 0.0  ;;  %v899_v19 = vmul.f32 0.01, %v835_v17  ;;  %v914_v22 = vsel %vm882_vm6, %v832_v11, %v898_v16 }
 0x2ef   :  { %v917_v21 = vsel %vm885_vm7, %v843_v14, %v901_v18 }
 0x2f0   :  { %v915_v23 = vsel %vm883_vm8, %v835_v17, %v899_v19  ;;  %v929_v24 = vpack.c.bf16 %v917_v21, %v916_v20 }
 0x2f1   :  { %v928_v25 = vpack.c.bf16 %v915_v23, %v914_v22 }
 0x2f3   :  { %1721 = vmatprep.mubr.bf16.mxu1 %v928_v25 }
 0x2f4   :  { %1722 = vmatmul.mubr.bf16.gmra.mrb[36].mxu1 %v929_v24 }
 0x2f8   :  { %v1695_v26 = vpop.f32.mrb[40].mxu0 }
 0x2f9   :  { %v856_v27 = vadd.f32 %v1695_v26, %v2208_v54  ;;  %v847_v28 = vpop.f32.mrb[41].mxu0 }
 0x2fa   :  { %v848_v29 = vadd.f32 %v2208_v54, %v847_v28  ;;  %v1696_v30 = vpop.f32.mrb[42].mxu0 }
 0x2fb   :  { %v904_v31 = vmul.f32 0.01, %v856_v27  ;;  %v859_v32 = vadd.f32 %v1696_v30, %v2208_v54  ;;  %v850_v33 = vpop.f32.mrb[43].mxu0  ;;  %vm888_vm9 = vcmp.gt.f32.partialorder %v856_v27, 0.0 }
 0x2fc   :  { %v902_v34 = vmul.f32 0.01, %v848_v29  ;;  %v851_v35 = vadd.f32 %v2208_v54, %v850_v33  ;;  %vm886_vm10 = vcmp.gt.f32.partialorder %v848_v29, 0.0 }
 0x2fd   :  { %vm889_vm11 = vcmp.gt.f32.partialorder %v859_v32, 0.0  ;;  %v905_v36 = vmul.f32 0.01, %v859_v32  ;;  %v920_v40 = vsel %vm888_vm9, %v856_v27, %v904_v31 }
 0x2fe   :  { %vm887_vm12 = vcmp.gt.f32.partialorder %v851_v35, 0.0  ;;  %v903_v39 = vmul.f32 0.01, %v851_v35  ;;  %v918_v42 = vsel %vm886_vm10, %v848_v29, %v902_v34 }
 0x2ff   :  { %v921_v41 = vsel %vm889_vm11, %v859_v32, %v905_v36 }
 0x300   :  { %v919_v43 = vsel %vm887_vm12, %v851_v35, %v903_v39  ;;  %v931_v44 = vpack.c.bf16 %v921_v41, %v920_v40 }
 0x301   :  { %v930_v45 = vpack.c.bf16 %v919_v43, %v918_v42 }
 0x303   :  { %1725 = vmatprep.mubr.bf16.mxu1 %v930_v45 }
 0x304   :  { %1726 = vmatmul.mubr.bf16.gmra.mrb[40].mxu1 %v931_v44 }
 0x308   :  { %v1699_v46 = vpop.f32.mrb[44].mxu0 }
 0x309   :  { %v872_v47 = vadd.f32 %v1699_v46, %v2208_v54  ;;  %v863_v48 = vpop.f32.mrb[45].mxu0 }
 0x30a   :  { %v864_v49 = vadd.f32 %v2208_v54, %v863_v48  ;;  %v1700_v50 = vpop.f32.mrb[46].mxu0 }
 0x30b   :  { %v908_v51 = vmul.f32 0.01, %v872_v47  ;;  %v875_v4 = vadd.f32 %v1700_v50, %v2208_v54  ;;  %v866_v52 = vpop.f32.mrb[47].mxu0  ;;  %vm892_vm13 = vcmp.gt.f32.partialorder %v872_v47, 0.0 }
 0x30c   :  { %v906_v53 = vmul.f32 0.01, %v864_v49  ;;  %v867_v55 = vadd.f32 %v2208_v54, %v866_v52  ;;  %vm890_vm14 = vcmp.gt.f32.partialorder %v864_v49, 0.0  ;;  %v1824_v54 = vld [vmem:[#allocation6 + $0x38] sm:$0xff]  }
 0x30d   :  { %vm893_vm15 = vcmp.gt.f32.partialorder %v875_v4, 0.0  ;;  %v909_v56 = vmul.f32 0.01, %v875_v4  ;;  %v924_v58 = vsel %vm892_vm13, %v872_v47, %v908_v51  ;;  %1747 = vmatprep.subr.bf16.mxu0 %v1824_v54 }
 0x30e   :  { %vm891_vm0 = vcmp.gt.f32.partialorder %v867_v55, 0.0  ;;  %v907_v57 = vmul.f32 0.01, %v867_v55  ;;  %v922_v38 = vsel %vm890_vm14, %v864_v49, %v906_v53  ;;  %1748 = vmatpush3.bf16.msra.mxu0 %v1824_v54 }
 0x30f   :  { %v925_v37 = vsel %vm893_vm15, %v875_v4, %v909_v56 }
 0x310   :  { %v923_v59 = vsel %vm891_vm0, %v867_v55, %v907_v57  ;;  %v933_v60 = vpack.c.bf16 %v925_v37, %v924_v58 }
 0x311   :  { %v932_v61 = vpack.c.bf16 %v923_v59, %v922_v38 }
 0x313   :  { %1729 = vmatprep.mubr.bf16.mxu1 %v932_v61 }
 0x314   :  { %1730 = vmatmul.mubr.bf16.gmra.mrb[44].mxu1 %v933_v60 }
 0x3b7   :  { %v1719_v1 = vpop.f32.mrb[32].mxu1 }
 0x3b8   :  { %v1048_v2 = vadd.f32 %v1719_v1, %v2229_v0  ;;  %v1039_v3 = vpop.f32.mrb[33].mxu1 }
 0x3b9   :  { %v1040_v5 = vadd.f32 %v2229_v0, %v1039_v3  ;;  %v1720_v6 = vpop.f32.mrb[34].mxu1 }
 0x3ba   :  { %v1120_v7 = vmul.f32 0.01, %v1048_v2  ;;  %v1051_v8 = vadd.f32 %v1720_v6, %v2229_v0  ;;  %v1042_v9 = vpop.f32.mrb[35].mxu1  ;;  %vm1104_vm1 = vcmp.gt.f32.partialorder %v1048_v2, 0.0 }
 0x3bb   :  { %v1118_v10 = vmul.f32 0.01, %v1040_v5  ;;  %v1043_v11 = vadd.f32 %v2229_v0, %v1042_v9  ;;  %vm1102_vm2 = vcmp.gt.f32.partialorder %v1040_v5, 0.0 }
 0x3bc   :  { %vm1105_vm3 = vcmp.gt.f32.partialorder %v1051_v8, 0.0  ;;  %v1121_v12 = vmul.f32 0.01, %v1051_v8  ;;  %v1136_v14 = vsel %vm1104_vm1, %v1048_v2, %v1120_v7 }
 0x3bd   :  { %vm1103_vm4 = vcmp.gt.f32.partialorder %v1043_v11, 0.0  ;;  %v1119_v13 = vmul.f32 0.01, %v1043_v11  ;;  %v1134_v17 = vsel %vm1102_vm2, %v1040_v5, %v1118_v10  ;;  %vm1470_vm2 = vcmask 7168  }
 0x3be   :  { %v1137_v15 = vsel %vm1105_vm3, %v1051_v8, %v1121_v12 }
 0x3bf   :  { %v1151_v16 = vpack.c.bf16 %v1137_v15, %v1136_v14  ;;  %v1135_v18 = vsel %vm1103_vm4, %v1043_v11, %v1119_v13  ;;  %v2250_v11 = vld [vmem:[%s2402_s10] ss:$0 sm:$0xff] }
 0x3c0   :  { %v1150_v19 = vpack.c.bf16 %v1135_v18, %v1134_v17 }
 0x3c2   :  { %1749 = vmatprep.mubr.bf16.mxu0 %v1150_v19 }
 0x3c3   :  { %1750 = vmatmul.mubr.bf16.vlgmr.msra.gmra.mrb[48].mxu0 %v1151_v16 }
 0x3c7   :  { %v1723_v20 = vpop.f32.mrb[36].mxu1 }
 0x3c8   :  { %v1064_v21 = vadd.f32 %v1723_v20, %v2229_v0  ;;  %v1055_v22 = vpop.f32.mrb[37].mxu1 }
 0x3c9   :  { %v1056_v23 = vadd.f32 %v2229_v0, %v1055_v22  ;;  %v1724_v24 = vpop.f32.mrb[38].mxu1 }
 0x3ca   :  { %v1124_v25 = vmul.f32 0.01, %v1064_v21  ;;  %v1067_v26 = vadd.f32 %v1724_v24, %v2229_v0  ;;  %v1058_v27 = vpop.f32.mrb[39].mxu1  ;;  %vm1108_vm5 = vcmp.gt.f32.partialorder %v1064_v21, 0.0 }
 0x3cb   :  { %v1122_v28 = vmul.f32 0.01, %v1056_v23  ;;  %v1059_v29 = vadd.f32 %v2229_v0, %v1058_v27  ;;  %vm1106_vm6 = vcmp.gt.f32.partialorder %v1056_v23, 0.0 }
 0x3cc   :  { %vm1109_vm7 = vcmp.gt.f32.partialorder %v1067_v26, 0.0  ;;  %v1125_v30 = vmul.f32 0.01, %v1067_v26  ;;  %v1140_v32 = vsel %vm1108_vm5, %v1064_v21, %v1124_v25 }
 0x3cd   :  { %vm1107_vm8 = vcmp.gt.f32.partialorder %v1059_v29, 0.0  ;;  %v1123_v31 = vmul.f32 0.01, %v1059_v29  ;;  %v1138_v34 = vsel %vm1106_vm6, %v1056_v23, %v1122_v28 }
 0x3ce   :  { %v1141_v33 = vsel %vm1109_vm7, %v1067_v26, %v1125_v30 }
 0x3cf   :  { %v1139_v35 = vsel %vm1107_vm8, %v1059_v29, %v1123_v31  ;;  %v1153_v36 = vpack.c.bf16 %v1141_v33, %v1140_v32 }
 0x3d0   :  { %v1152_v39 = vpack.c.bf16 %v1139_v35, %v1138_v34 }
 0x3d2   :  { %1753 = vmatprep.mubr.bf16.mxu0 %v1152_v39 }
 0x3d3   :  { %1754 = vmatmul.mubr.bf16.gmra.mrb[52].mxu0 %v1153_v36 }
 0x3d7   :  { %v1727_v40 = vpop.f32.mrb[40].mxu1 }
 0x3d8   :  { %v1080_v41 = vadd.f32 %v1727_v40, %v2229_v0  ;;  %v1071_v42 = vpop.f32.mrb[41].mxu1 }
 0x3d9   :  { %v1072_v43 = vadd.f32 %v2229_v0, %v1071_v42  ;;  %v1728_v44 = vpop.f32.mrb[42].mxu1 }
 0x3da   :  { %v1128_v45 = vmul.f32 0.01, %v1080_v41  ;;  %v1083_v46 = vadd.f32 %v1728_v44, %v2229_v0  ;;  %v1074_v47 = vpop.f32.mrb[43].mxu1  ;;  %vm1112_vm9 = vcmp.gt.f32.partialorder %v1080_v41, 0.0 }
 0x3db   :  { %v1126_v48 = vmul.f32 0.01, %v1072_v43  ;;  %v1075_v49 = vadd.f32 %v2229_v0, %v1074_v47  ;;  %vm1110_vm10 = vcmp.gt.f32.partialorder %v1072_v43, 0.0 }
 0x3dc   :  { %vm1113_vm11 = vcmp.gt.f32.partialorder %v1083_v46, 0.0  ;;  %v1129_v50 = vmul.f32 0.01, %v1083_v46  ;;  %v1144_v4 = vsel %vm1112_vm9, %v1080_v41, %v1128_v45 }
 0x3dd   :  { %vm1111_vm12 = vcmp.gt.f32.partialorder %v1075_v49, 0.0  ;;  %v1127_v51 = vmul.f32 0.01, %v1075_v49  ;;  %v1142_v53 = vsel %vm1110_vm10, %v1072_v43, %v1126_v48 }
 0x3de   :  { %v1145_v52 = vsel %vm1113_vm11, %v1083_v46, %v1129_v50 }
 0x3df   :  { %v1143_v55 = vsel %vm1111_vm12, %v1075_v49, %v1127_v51  ;;  %v1155_v56 = vpack.c.bf16 %v1145_v52, %v1144_v4 }
 0x3e0   :  { %v1154_v57 = vpack.c.bf16 %v1143_v55, %v1142_v53 }
 0x3e2   :  { %1757 = vmatprep.mubr.bf16.mxu0 %v1154_v57 }
 0x3e3   :  { %1758 = vmatmul.mubr.bf16.gmra.mrb[56].mxu0 %v1155_v56 }
 0x3e7   :  { %v1731_v58 = vpop.f32.mrb[44].mxu1 }
 0x3e8   :  { %v1096_v37 = vadd.f32 %v1731_v58, %v2229_v0  ;;  %v1087_v38 = vpop.f32.mrb[45].mxu1 }
 0x3e9   :  { %v1088_v59 = vadd.f32 %v2229_v0, %v1087_v38  ;;  %v1732_v60 = vpop.f32.mrb[46].mxu1 }
 0x3ea   :  { %v1132_v61 = vmul.f32 0.01, %v1096_v37  ;;  %v1099_v62 = vadd.f32 %v1732_v60, %v2229_v0  ;;  %v1090_v63 = vpop.f32.mrb[47].mxu1  ;;  %vm1116_vm13 = vcmp.gt.f32.partialorder %v1096_v37, 0.0 }
 0x3eb   :  { %v1130_v54 = vmul.f32 0.01, %v1088_v59  ;;  %v1091_v1 = vadd.f32 %v2229_v0, %v1090_v63  ;;  %vm1114_vm14 = vcmp.gt.f32.partialorder %v1088_v59, 0.0 }
 0x3ec   :  { %vm1117_vm15 = vcmp.gt.f32.partialorder %v1099_v62, 0.0  ;;  %v1133_v2 = vmul.f32 0.01, %v1099_v62  ;;  %v1148_v5 = vsel %vm1116_vm13, %v1096_v37, %v1132_v61 }
 0x3ed   :  { %vm1115_vm0 = vcmp.gt.f32.partialorder %v1091_v1, 0.0  ;;  %v1131_v3 = vmul.f32 0.01, %v1091_v1  ;;  %v1146_v7 = vsel %vm1114_vm14, %v1088_v59, %v1130_v54 }
 0x3ee   :  { %v1149_v6 = vsel %vm1117_vm15, %v1099_v62, %v1133_v2 }
 0x3ef   :  { %v1147_v8 = vsel %vm1115_vm0, %v1091_v1, %v1131_v3  ;;  %v1157_v9 = vpack.c.bf16 %v1149_v6, %v1148_v5 }
 0x3f0   :  { %v1156_v10 = vpack.c.bf16 %v1147_v8, %v1146_v7 }
 0x3f2   :  { %1761 = vmatprep.mubr.bf16.mxu0 %v1156_v10 }
 0x3f3   :  { %1762 = vmatmul.mubr.bf16.gmra.mrb[60].mxu0 %v1157_v9 }
 0x496   :  { %v1751_v12 = vpop.f32.mrb[48].mxu0 }
 0x497   :  { %v1272_v0 = vadd.f32 %v1751_v12, %v2250_v11  ;;  %v1263_v13 = vpop.f32.mrb[49].mxu0 }
 0x498   :  { %v2254_v14 = vadd.f32 %v2250_v11, %v1263_v13  ;;  %v1752_v15 = vpop.f32.mrb[50].mxu0 }
 0x499   :  { %v1328_v16 = vand.u32 2147483647, %v1272_v0  ;;  %v2257_v17 = vadd.f32 %v1752_v15, %v2250_v11  ;;  %v1266_v18 = vpop.f32.mrb[51].mxu0  ;;  %vm1392_vm1 = vcmp.ge.f32.partialorder %v1272_v0, 0.0 }
 0x49a   :  { %v1326_v19 = vand.u32 2147483647, %v2254_v14  ;;  %v2261_v20 = vadd.f32 %v2250_v11, %v1266_v18  ;;  %vm1390_vm3 = vcmp.ge.f32.partialorder %v2254_v14, 0.0 }
 0x49b   :  { %v1344_v21 = vsub.f32 0.0, %v1328_v16  ;;  %v1329_v22 = vand.u32 2147483647, %v2257_v17  ;;  %vm1393_vm4 = vcmp.ge.f32.partialorder %v2257_v17, 0.0 }
 0x49c   :  { %v1342_v23 = vsub.f32 0.0, %v1326_v19  ;;  %v1327_v24 = vand.u32 2147483647, %v2261_v20  ;;  %vm1391_vm5 = vcmp.ge.f32.partialorder %v2261_v20, 0.0 }
 0x49d   :  { %v1362_v25 = vmul.f32 1.442695, %v1344_v21  ;;  %v1345_v26 = vsub.f32 0.0, %v1329_v22 }
 0x49e   :  { %v1358_v27 = vmul.f32 1.442695, %v1342_v23  ;;  %v1343_v28 = vsub.f32 0.0, %v1327_v24 }
 0x49f   :  { %1825 = vpow2.f32 %v1362_v25  ;;  %v1364_v29 = vmul.f32 1.442695, %v1345_v26 }
 0x4a0   :  { %1827 = vpow2.f32 %v1358_v27  ;;  %v1360_v30 = vmul.f32 1.442695, %v1343_v28 }
 0x4a1   :  { %1829 = vpow2.f32 %v1364_v29 }
 0x4a2   :  { %1831 = vpow2.f32 %v1360_v30 }
 0x4a6   :  { %v1755_v31 = vpop.f32.mrb[52].mxu0 }
 0x4a7   :  { %v2266_v32 = vadd.f32 %v1755_v31, %v2250_v11  ;;  %v1279_v33 = vpop.f32.mrb[53].mxu0 }
 0x4a8   :  { %v2269_v34 = vadd.f32 %v2250_v11, %v1279_v33  ;;  %v1756_v35 = vpop.f32.mrb[54].mxu0 }
 0x4a9   :  { %v1826_v36 = vpop.eup %1825  ;;  %v1332_v39 = vand.u32 2147483647, %v2266_v32  ;;  %v2273_v40 = vadd.f32 %v1756_v35, %v2250_v11  ;;  %v1282_v41 = vpop.f32.mrb[55].mxu0  ;;  %vm1396_vm6 = vcmp.ge.f32.partialorder %v2266_v32, 0.0 }
 0x4aa   :  { %v1828_v42 = vpop.eup %1827  ;;  %v1424_v43 = vadd.f32 1.0, %v1826_v36  ;;  %v1330_v44 = vand.u32 2147483647, %v2269_v34  ;;  %v2278_v56 = vadd.f32 %v2250_v11, %v1282_v41  ;;  %v1408_v60 = vsel %vm1392_vm1, 1.0, %v1826_v36 }
 0x4ab   :  { %v1830_v45 = vpop.eup %1829  ;;  %v1422_v46 = vadd.f32 1.0, %v1828_v42  ;;  %v1348_v47 = vsub.f32 0.0, %v1332_v39  ;;  %v1333_v48 = vand.u32 2147483647, %v2273_v40  ;;  %v1406_v54 = vsel %vm1390_vm3, 1.0, %v1828_v42 }
 0x4ac   :  { %v1832_v49 = vpop.eup %1831  ;;  %1833 = vrcp.f32 %v1424_v43  ;;  %v1425_v50 = vadd.f32 1.0, %v1830_v45  ;;  %v1346_v51 = vsub.f32 0.0, %v1330_v44  ;;  %v1331_v58 = vand.u32 2147483647, %v2278_v56 }
 0x4ad   :  { %1835 = vrcp.f32 %v1422_v46  ;;  %v1423_v4 = vadd.f32 1.0, %v1832_v49  ;;  %v1370_v52 = vmul.f32 1.442695, %v1348_v47  ;;  %v1349_v55 = vsub.f32 0.0, %v1333_v48 }
 0x4ae   :  { %1837 = vrcp.f32 %v1425_v50  ;;  %v1366_v53 = vmul.f32 1.442695, %v1346_v51  ;;  %v1347_v37 = vsub.f32 0.0, %v1331_v58  ;;  %v1409_v6 = vsel %vm1393_vm4, 1.0, %v1830_v45 }
 0x4af   :  { %1839 = vrcp.f32 %v1423_v4  ;;  %v1372_v57 = vmul.f32 1.442695, %v1349_v55  ;;  %v1407_v12 = vsel %vm1391_vm5, 1.0, %v1832_v49  ;;  %vm1394_vm7 = vcmp.ge.f32.partialorder %v2269_v34, 0.0 }
 0x4b0   :  { %1841 = vpow2.f32 %v1370_v52  ;;  %v1368_v38 = vmul.f32 1.442695, %v1347_v37  ;;  %vm1397_vm8 = vcmp.ge.f32.partialorder %v2273_v40, 0.0  ;;  %vm1395_vm9 = vcmp.ge.f32.partialorder %v2278_v56, 0.0 }
 0x4b1   :  { %1843 = vpow2.f32 %v1366_v53 }
 0x4b2   :  { %1845 = vpow2.f32 %v1372_v57 }
 0x4b3   :  { %1847 = vpow2.f32 %v1368_v38 }
 0x4b6   :  { %v1834_v59 = vpop.eup %1833  ;;  %v1759_v61 = vpop.f32.mrb[56].mxu0 }
 0x4b7   :  { %v1836_v62 = vpop.eup %1835  ;;  %v1443_v63 = vmul.f32 %v1834_v59, %v1408_v60  ;;  %v2284_v1 = vadd.f32 %v1759_v61, %v2250_v11  ;;  %v1295_v2 = vpop.f32.mrb[57].mxu0 }
 0x4b8   :  { %v1838_v3 = vpop.eup %1837  ;;  %v1439_v5 = vmul.f32 %v1836_v62, %v1406_v54  ;;  %v2288_v7 = vadd.f32 %v2250_v11, %v1295_v2  ;;  %v1760_v8 = vpop.f32.mrb[58].mxu0 }
 0x4b9   :  { %v1840_v9 = vpop.eup %1839  ;;  %1473 = vst.msk [vmem:[%s2403_s11 + $0x10] sm:$0xff] %vm1470_vm2, %v1443_v63  ;;  %v1445_v10 = vmul.f32 %v1838_v3, %v1409_v6  ;;  %v1336_v0 = vand.u32 2147483647, %v2284_v1  ;;  %v2296_v13 = vadd.f32 %v1760_v8, %v2250_v11  ;;  %v1298_v14 = vpop.f32.mrb[59].mxu0  ;;  %vm1400_vm10 = vcmp.ge.f32.partialorder %v2284_v1, 0.0 }
 0x4ba   :  { %v1842_v15 = vpop.eup %1841  ;;  %1471 = vst.msk [vmem:[%s2403_s11] sm:$0xff] %vm1470_vm2, %v1439_v5  ;;  %v1441_v16 = vmul.f32 %v1840_v9, %v1407_v12  ;;  %v1334_v17 = vand.u32 2147483647, %v2288_v7  ;;  %v2304_v18 = vadd.f32 %v2250_v11, %v1298_v14  ;;  %vm1398_vm11 = vcmp.ge.f32.partialorder %v2288_v7, 0.0 }
 0x4bb   :  { %v1844_v19 = vpop.eup %1843  ;;  %1474 = vst.msk [vmem:[%s2403_s11 + $0x18] sm:$0xff] %vm1470_vm2, %v1445_v10  ;;  %v1428_v20 = vadd.f32 1.0, %v1842_v15  ;;  %v1352_v21 = vsub.f32 0.0, %v1336_v0  ;;  %v1337_v22 = vand.u32 2147483647, %v2296_v13  ;;  %v1412_v43 = vsel %vm1396_vm6, 1.0, %v1842_v15 }
 0x4bc   :  { %v1846_v23 = vpop.eup %1845  ;;  %1472 = vst.msk [vmem:[%s2403_s11 + $0x8] sm:$0xff] %vm1470_vm2, %v1441_v16  ;;  %v1426_v24 = vadd.f32 1.0, %v1844_v19  ;;  %v1350_v25 = vsub.f32 0.0, %v1334_v17  ;;  %v1335_v30 = vand.u32 2147483647, %v2304_v18  ;;  %v1410_v48 = vsel %vm1394_vm7, 1.0, %v1844_v19 }
 0x4bd   :  { %1849 = vrcp.f32 %v1428_v20  ;;  %v1429_v26 = vadd.f32 1.0, %v1846_v23  ;;  %v1378_v27 = vmul.f32 1.442695, %v1352_v21  ;;  %v1353_v29 = vsub.f32 0.0, %v1337_v22  ;;  %v1848_v35 = vpop.eup %1847 }
 0x4be   :  { %1851 = vrcp.f32 %v1426_v24  ;;  %v1374_v28 = vmul.f32 1.442695, %v1350_v25  ;;  %v1351_v33 = vsub.f32 0.0, %v1335_v30  ;;  %v1427_v36 = vadd.f32 1.0, %v1848_v35 }
 0x4bf   :  { %1853 = vrcp.f32 %v1429_v26  ;;  %v1380_v31 = vmul.f32 1.442695, %v1353_v29  ;;  %v1413_v4 = vsel %vm1397_vm8, 1.0, %v1846_v23  ;;  %v1411_v63 = vsel %vm1395_vm9, 1.0, %v1848_v35 }
 0x4c0   :  { %1855 = vpow2.f32 %v1378_v27  ;;  %v1376_v39 = vmul.f32 1.442695, %v1351_v33  ;;  %vm1401_vm12 = vcmp.ge.f32.partialorder %v2296_v13, 0.0  ;;  %vm1399_vm13 = vcmp.ge.f32.partialorder %v2304_v18, 0.0 }
 0x4c1   :  { %1857 = vpow2.f32 %v1374_v28 }
 0x4c2   :  { %1859 = vpow2.f32 %v1380_v31 }
 0x4c3   :  { %1861 = vrcp.f32 %v1427_v36 }
 0x4c4   :  { %1863 = vpow2.f32 %v1376_v39 }
 0x4c6   :  { %v1763_v41 = vpop.f32.mrb[60].mxu0 }
 0x4c7   :  { %v1850_v42 = vpop.eup %1849  ;;  %v2319_v44 = vadd.f32 %v1763_v41, %v2250_v11  ;;  %v1311_v45 = vpop.f32.mrb[61].mxu0 }
 0x4c8   :  { %v1852_v46 = vpop.eup %1851  ;;  %v1451_v47 = vmul.f32 %v1850_v42, %v1412_v43  ;;  %v2323_v49 = vadd.f32 %v2250_v11, %v1311_v45  ;;  %v1764_v50 = vpop.f32.mrb[62].mxu0 }
 0x4c9   :  { %v1854_v51 = vpop.eup %1853  ;;  %v1447_v32 = vmul.f32 %v1852_v46, %v1410_v48  ;;  %v1340_v52 = vand.u32 2147483647, %v2319_v44  ;;  %v2327_v34 = vadd.f32 %v1764_v50, %v2250_v11  ;;  %v1314_v53 = vpop.f32.mrb[63].mxu0  ;;  %vm1404_vm14 = vcmp.ge.f32.partialorder %v2319_v44, 0.0 }
 0x4ca   :  { %v1856_v55 = vpop.eup %1855  ;;  %1477 = vst.msk [vmem:[%s2403_s11 + $0x30] sm:$0xff] %vm1470_vm2, %v1451_v47  ;;  %v1453_v40 = vmul.f32 %v1854_v51, %v1413_v4  ;;  %v1338_v57 = vand.u32 2147483647, %v2323_v49  ;;  %v2335_v58 = vadd.f32 %v2250_v11, %v1314_v53  ;;  %vm1402_vm15 = vcmp.ge.f32.partialorder %v2323_v49, 0.0 }
 0x4cb   :  { %v1858_v37 = vpop.eup %1857  ;;  %1475 = vst.msk [vmem:[%s2403_s11 + $0x20] sm:$0xff] %vm1470_vm2, %v1447_v32  ;;  %v1432_v38 = vadd.f32 1.0, %v1856_v55  ;;  %v1356_v59 = vsub.f32 0.0, %v1340_v52  ;;  %v1341_v60 = vand.u32 2147483647, %v2327_v34  ;;  %v1416_v16 = vsel %vm1400_vm10, 1.0, %v1856_v55 }
 0x4cc   :  { %v1860_v61 = vpop.eup %1859  ;;  %1478 = vst.msk [vmem:[%s2403_s11 + $0x38] sm:$0xff] %vm1470_vm2, %v1453_v40  ;;  %v1430_v11 = vadd.f32 1.0, %v1858_v37  ;;  %v1354_v62 = vsub.f32 0.0, %v1338_v57  ;;  %v1339_v8 = vand.u32 2147483647, %v2335_v58  ;;  %v1414_v20 = vsel %vm1398_vm11, 1.0, %v1858_v37 }
 0x4cd   :  { %1865 = vrcp.f32 %v1432_v38  ;;  %v1433_v54 = vadd.f32 1.0, %v1860_v61  ;;  %v1386_v2 = vmul.f32 1.442695, %v1356_v59  ;;  %v1862_v3 = vpop.eup %1861  ;;  %v1357_v6 = vsub.f32 0.0, %v1341_v60 }
 0x4ce   :  { %1867 = vrcp.f32 %v1430_v11  ;;  %v1382_v5 = vmul.f32 1.442695, %v1354_v62  ;;  %v1864_v9 = vpop.eup %1863  ;;  %v1449_v10 = vmul.f32 %v1862_v3, %v1411_v63  ;;  %v1355_v56 = vsub.f32 0.0, %v1339_v8 }
 0x4cf   :  { %1869 = vrcp.f32 %v1433_v54  ;;  %v1431_v12 = vadd.f32 1.0, %v1864_v9  ;;  %v1388_v0 = vmul.f32 1.442695, %v1357_v6  ;;  %v1417_v23 = vsel %vm1401_vm12, 1.0, %v1860_v61 }
 0x4d0   :  { %1871 = vpow2.f32 %v1386_v2  ;;  %1476 = vst.msk [vmem:[%s2403_s11 + $0x28] sm:$0xff] %vm1470_vm2, %v1449_v10  ;;  %v1384_v14 = vmul.f32 1.442695, %v1355_v56  ;;  %v1415_v26 = vsel %vm1399_vm13, 1.0, %v1864_v9  ;;  %vm1405_vm0 = vcmp.ge.f32.partialorder %v2327_v34, 0.0 }
 0x4d1   :  { %1873 = vpow2.f32 %v1382_v5  ;;  %vm1403_vm1 = vcmp.ge.f32.partialorder %v2335_v58, 0.0 }
 0x4d2   :  { %1875 = vrcp.f32 %v1431_v12 }
 0x4d3   :  { %1877 = vpow2.f32 %v1388_v0 }
 0x4d4   :  { %1879 = vpow2.f32 %v1384_v14 }
 0x4d7   :  { %v1866_v15 = vpop.eup %1865 }
 0x4d8   :  { %v1868_v17 = vpop.eup %1867  ;;  %v1459_v19 = vmul.f32 %v1866_v15, %v1416_v16 }
 0x4d9   :  { %v1870_v21 = vpop.eup %1869  ;;  %v1455_v22 = vmul.f32 %v1868_v17, %v1414_v20 }
 0x4da   :  { %v1872_v24 = vpop.eup %1871  ;;  %1481 = vst.msk [vmem:[%s2403_s11 + $0x50] sm:$0xff] %vm1470_vm2, %v1459_v19  ;;  %v1461_v25 = vmul.f32 %v1870_v21, %v1417_v23 }
 0x4db   :  { %v1874_v1 = vpop.eup %1873  ;;  %1479 = vst.msk [vmem:[%s2403_s11 + $0x40] sm:$0xff] %vm1470_vm2, %v1455_v22  ;;  %v1436_v7 = vadd.f32 1.0, %v1872_v24  ;;  %v1420_v35 = vsel %vm1404_vm14, 1.0, %v1872_v24 }
 0x4dc   :  { %v1876_v13 = vpop.eup %1875  ;;  %1482 = vst.msk [vmem:[%s2403_s11 + $0x58] sm:$0xff] %vm1470_vm2, %v1461_v25  ;;  %v1434_v27 = vadd.f32 1.0, %v1874_v1  ;;  %v1418_v41 = vsel %vm1402_vm15, 1.0, %v1874_v1 }
 0x4dd   :  { %v1878_v28 = vpop.eup %1877  ;;  %v1457_v29 = vmul.f32 %v1876_v13, %v1415_v26  ;;  %1881 = vrcp.f32 %v1436_v7 }
 0x4de   :  { %1883 = vrcp.f32 %v1434_v27  ;;  %v1437_v30 = vadd.f32 1.0, %v1878_v28  ;;  %v1880_v31 = vpop.eup %1879  ;;  %v1421_v45 = vsel %vm1405_vm0, 1.0, %v1878_v28 }
 0x4df   :  { %1480 = vst.msk [vmem:[%s2403_s11 + $0x48] sm:$0xff] %vm1470_vm2, %v1457_v29  ;;  %v1435_v18 = vadd.f32 1.0, %v1880_v31  ;;  %v1419_v47 = vsel %vm1403_vm1, 1.0, %v1880_v31 }
 0x4e0   :  { %1885 = vrcp.f32 %v1437_v30 }
 0x4e1   :  { %1887 = vrcp.f32 %v1435_v18 }
 0x4e7   :  { %v1882_v33 = vpop.eup %1881 }
 0x4e8   :  { %v1884_v36 = vpop.eup %1883  ;;  %v1467_v39 = vmul.f32 %v1882_v33, %v1420_v35 }
 0x4e9   :  { %v1463_v42 = vmul.f32 %v1884_v36, %v1418_v41 }
 0x4ea   :  { %v1886_v43 = vpop.eup %1885  ;;  %1485 = vst.msk [vmem:[%s2403_s11 + $0x70] sm:$0xff] %vm1470_vm2, %v1467_v39 }
 0x4eb   :  { %1483 = vst.msk [vmem:[%s2403_s11 + $0x60] sm:$0xff] %vm1470_vm2, %v1463_v42  ;;  %v1469_v44 = vmul.f32 %v1886_v43, %v1421_v45  ;;  %v1888_v46 = vpop.eup %1887 }
 0x4ec   :  { %v1465_v48 = vmul.f32 %v1888_v46, %v1419_v47 }
 0x4ed   :  { %1486 = vst.msk [vmem:[%s2403_s11 + $0x78] sm:$0xff] %vm1470_vm2, %v1469_v44 }
 0x4ee   :  { %1484 = vst.msk [vmem:[%s2403_s11 + $0x68] sm:$0xff] %vm1470_vm2, %v1465_v48 }
 0x4ef   :  { %1491 = vsyncpa [#allocation3], 1 }
 0x4f0   :  { %1492 = vsyncpa [#allocation5], 1 }

</bundles_post_ra>
